<compile_context>
chip_gen: v5e
topology: v5e:2x2
jax: 0.10.0
libtpu: 0.0.40
codegen_flags: <defaults>
</compile_context>

<pallas_src>
import functools

import jax
import jax.numpy as jnp
from jax.experimental import pallas as pl
from jax.experimental.pallas import tpu as pltpu

EPS = 1e-5  # nn.BatchNorm1d default eps


def _round_up(x, m):
    return (x + m - 1) // m * m


def _cdiv(a, b):
    return -(-a // b)


# ------------------------------------------------------------------ plan ----

def _plan(K, N, block_n, single_block_bytes):
    """Static tiling plan, shared by prepare_params and linear_block."""
    assert block_n > 0 and block_n % 128 == 0, "block_n must be a multiple of 128"
    k_pad = _round_up(K, 128)
    n_pad = _round_up(N, 128)

    # Small problem: one monolithic block (overhead-dominated regime).
    if k_pad * n_pad * 2 <= single_block_bytes:
        return k_pad, n_pad, n_pad, 1

    # Cap the weight tile so the double-buffered bf16 stream stays well under
    # v7x's 64 MiB VMEM even for large K (2 bufs * k_pad * tn * 2B <= ~24 MiB).
    max_tn = max(128, (24 * 1024 * 1024 // (2 * k_pad * 2)) // 128 * 128)
    eff_block_n = min(block_n, max_tn)

    # Pad N *up* to a multiple of a roughly-equal, 128-aligned tile.
    num_tiles = _cdiv(n_pad, eff_block_n)
    tn = _round_up(_cdiv(n_pad, num_tiles), 128)
    n_pad = tn * num_tiles
    return k_pad, n_pad, tn, num_tiles


# ---------------------------------------------------------------- kernel ----

def _linear_bn_kernel(x_ref, w_ref, b_ref, g_ref, beta_ref, o_ref):
    # x: (B, Kp) bf16   w: (Kp, TN) bf16   b/g/beta: (1, TN) f32   o: (B, TN) f32
    y = jnp.dot(x_ref[...], w_ref[...], preferred_element_type=jnp.float32)
    y = y + b_ref[...]
    y = jnp.maximum(y, 0.0)                                       # ReLU
    # BatchNorm1d, training mode: per-feature stats over the full batch.
    mean = jnp.mean(y, axis=0, keepdims=True)
    var = jnp.mean(jnp.square(y - mean), axis=0, keepdims=True)   # biased var
    scale = g_ref[...] * jax.lax.rsqrt(var + EPS)                 # EUP slot
    shift = beta_ref[...] - mean * scale
    o_ref[...] = y * scale + shift                                # single FMA


# ---------------------------------------------------------- param staging ---

def prepare_params(w, b, g, beta, *, block_n=512,
                   single_block_bytes=8 * 1024 * 1024):
    """One-time staging: pad params to the kernel layout, cast weights to bf16."""
    K, N = w.shape
    k_pad, n_pad, _, _ = _plan(K, N, block_n, single_block_bytes)
    wb = jnp.pad(w, ((0, k_pad - K), (0, n_pad - N))).astype(jnp.bfloat16)

    def _pad_vec(v):
        return jnp.pad(v.astype(jnp.float32).reshape(1, -1),
                       ((0, 0), (0, n_pad - N)))

    return wb, _pad_vec(b), _pad_vec(g), _pad_vec(beta)


# --------------------------------------------------------------- wrapper ----

@functools.partial(jax.jit,
                   static_argnames=("n_out", "block_n", "single_block_bytes"))
def linear_block(x, wb, bb, gb, betab, *, n_out, block_n=512,
                 single_block_bytes=8 * 1024 * 1024):
    """BatchNorm1d(ReLU(x @ W + b)), training-mode batch statistics.

    x: (B, K) f32 (unpadded); wb/bb/gb/betab: outputs of prepare_params.
    Returns (B, n_out) f32.
    """
    B, K = x.shape
    k_pad, n_pad, tn, num_tiles = _plan(K, n_out, block_n, single_block_bytes)
    assert wb.shape == (k_pad, n_pad), (wb.shape, (k_pad, n_pad))
    assert bb.shape == gb.shape == betab.shape == (1, n_pad)

    # Only the (small) activation is padded / cast per call.
    xb = jnp.pad(x, ((0, 0), (0, k_pad - K))).astype(jnp.bfloat16)

    # Per-step VMEM residency estimate (+50% headroom), capped under v7x's
    # 64 MiB physical VMEM and floored at v5e's 16 MiB default scoped limit.
    x_bufs = 1 if num_tiles > 1 else 2
    vmem_bytes = (2 * k_pad * tn * 2            # double-buffered weight tile
                  + x_bufs * B * k_pad * 2      # resident x
                  + 2 * B * tn * 4              # double-buffered output tile
                  + 3 * 2 * tn * 4              # bias / gamma / beta tiles
                  + 2 * B * tn * 4)             # y + intermediates
    vmem_limit = min(max(vmem_bytes * 3 // 2, 16 * 1024 * 1024),
                     60 * 1024 * 1024)

    # 'parallel' only when each v7x TensorCore keeps >= 2 steps, so the
    # weight-tile DMA still overlaps the matmul after megacore sharding.
    semantics = ("parallel",) if num_tiles >= 4 else ("arbitrary",)

    if num_tiles > 1:
        # Resident x: constant index map -> no re-DMA; single buffer saves VMEM.
        x_spec = pl.BlockSpec((B, k_pad), lambda j: (0, 0),
                              pipeline_mode=pl.Buffered(1))
    else:
        x_spec = pl.BlockSpec((B, k_pad), lambda j: (0, 0))

    out = pl.pallas_call(
        _linear_bn_kernel,
        out_shape=jax.ShapeDtypeStruct((B, n_pad), jnp.float32),
        grid=(num_tiles,),
        in_specs=[
            x_spec,
            pl.BlockSpec((k_pad, tn), lambda j: (0, j)),   # streamed weights
            pl.BlockSpec((1, tn), lambda j: (0, j)),       # bias
            pl.BlockSpec((1, tn), lambda j: (0, j)),       # gamma
            pl.BlockSpec((1, tn), lambda j: (0, j)),       # beta
        ],
        out_specs=pl.BlockSpec((B, tn), lambda j: (0, j)),
        compiler_params=pltpu.CompilerParams(
            dimension_semantics=semantics,
            vmem_limit_bytes=vmem_limit),
    )(xb, wb, bb, gb, betab)

    return out[:, :n_out]


# ---------------------------------------------------------------- params ----

def init_linear_block_params(key, input_prev, embed_dim):
    """PyTorch defaults: Linear U(-1/sqrt(fan_in), ..), BN weight=1, bias=0."""
    kw, kb = jax.random.split(key)
    bound = 1.0 / float(input_prev) ** 0.5
    w = jax.random.uniform(kw, (input_prev, embed_dim), jnp.float32, -bound, bound)
    b = jax.random.uniform(kb, (embed_dim,), jnp.float32, -bound, bound)
    g = jnp.ones((embed_dim,), jnp.float32)
    beta = jnp.zeros((embed_dim,), jnp.float32)
    return w, b, g, beta


# ----------------------------------------------------------------- check ----

def _ref(x, w, b, g, beta):
    """Pure-JAX reference with the same bf16-weight numerics as the kernel."""
    y = jnp.dot(x.astype(jnp.bfloat16), w.astype(jnp.bfloat16),
                preferred_element_type=jnp.float32)
    y = y + b
    y = jnp.maximum(y, 0.0)
    m = jnp.mean(y, axis=0, keepdims=True)
    v = jnp.mean(jnp.square(y - m), axis=0, keepdims=True)
    return (y - m) * jax.lax.rsqrt(v + EPS) * g + beta


# ------------------------------------------------------------------- main ---

if __name__ == "__main__":
    key = jax.random.PRNGKey(0)
    k1, k2, k3, k4 = jax.random.split(key, 4)

    # --- Test 1: LinearBlock shapes from cube.py (ragged dims exercise the
    #     128-padding); small enough to take the single-block fast path.
    B, K, N = 8, 324, 1000
    w, b, g, beta = init_linear_block_params(k1, K, N)
    x = jax.random.normal(k2, (B, K), jnp.float32)

    params = prepare_params(w, b, g, beta, block_n=512)      # one-time staging
    out = linear_block(x, *params, n_out=N, block_n=512)
    jax.block_until_ready(out)
    assert out.shape == (B, N) and out.dtype == jnp.float32
    ref = _ref(x, w, b, g, beta)
    assert jnp.allclose(out, ref, atol=5e-2, rtol=5e-2), \
        float(jnp.max(jnp.abs(out - ref)))

    # --- Test 2: force the tiled / streamed-weight path on small shapes
    #     (single_block_bytes=0) to exercise the multi-step pipeline.
    B2, K2, N2 = 16, 200, 700
    w2, b2, g2, beta2 = init_linear_block_params(k3, K2, N2)
    x2 = jax.random.normal(k4, (B2, K2), jnp.float32)

    params2 = prepare_params(w2, b2, g2, beta2, block_n=256, single_block_bytes=0)
    out2 = linear_block(x2, *params2, n_out=N2, block_n=256, single_block_bytes=0)
    jax.block_until_ready(out2)
    assert out2.shape == (B2, N2) and out2.dtype == jnp.float32
    ref2 = _ref(x2, w2, b2, g2, beta2)
    assert jnp.allclose(out2, ref2, atol=5e-2, rtol=5e-2), \
        float(jnp.max(jnp.abs(out2 - ref2)))

    print("KERNEL_OK")
</pallas_src>

<mosaic_0001>
module attributes {stable_mosaic.version = 11 : i64} {
  func.func @_linear_bn_kernel(%arg0: i32, %arg1: memref<8x384xbf16, #tpu.memory_space<vmem>>, %arg2: memref<384x1024xbf16, #tpu.memory_space<vmem>>, %arg3: memref<1x1024xf32, #tpu.memory_space<vmem>>, %arg4: memref<1x1024xf32, #tpu.memory_space<vmem>>, %arg5: memref<1x1024xf32, #tpu.memory_space<vmem>>, %arg6: memref<8x1024xf32, #tpu.memory_space<vmem>>) attributes {dimension_semantics = [#tpu.dimension_semantics<arbitrary>], iteration_bounds = array<i64: 1>, scalar_prefetch = 0 : i64, scratch_operands = 0 : i64, tpu.core_type = #tpu.core_type<tc>, window_params = [{pipeline_mode = #tpu.pipeline_mode<synchronous>, transform_indices = @transform_0, window_bounds = array<i64: 8, 384>}, {transform_indices = @transform_1, window_bounds = array<i64: 384, 1024>}, {transform_indices = @transform_2, window_bounds = array<i64: 1, 1024>}, {transform_indices = @transform_3, window_bounds = array<i64: 1, 1024>}, {transform_indices = @transform_4, window_bounds = array<i64: 1, 1024>}, {transform_indices = @transform_5, window_bounds = array<i64: 8, 1024>}]} {
    %c0 = arith.constant 0 : index
    %c0_0 = arith.constant 0 : index
    %0 = vector.load %arg1[%c0, %c0_0] : memref<8x384xbf16, #tpu.memory_space<vmem>>, vector<8x384xbf16>
    %c0_1 = arith.constant 0 : index
    %c0_2 = arith.constant 0 : index
    %1 = vector.load %arg2[%c0_1, %c0_2] : memref<384x1024xbf16, #tpu.memory_space<vmem>>, vector<384x1024xbf16>
    %cst = arith.constant dense<0.000000e+00> : vector<8x1024xf32>
    %2 = tpu.matmul %0, %1, %cst {dimension_numbers = #tpu.dot_dimension_numbers<[1], [0], [0], [1], [0, 0, 1, 1], [], []>} : vector<8x384xbf16>, vector<384x1024xbf16>, vector<8x1024xf32> -> vector<8x1024xf32>
    %c0_3 = arith.constant 0 : index
    %c0_4 = arith.constant 0 : index
    %3 = vector.load %arg3[%c0_3, %c0_4] : memref<1x1024xf32, #tpu.memory_space<vmem>>, vector<1x1024xf32>
    %4 = vector.broadcast %3 : vector<1x1024xf32> to vector<8x1024xf32>
    %5 = arith.addf %2, %4 : vector<8x1024xf32>
    %cst_5 = arith.constant 0.000000e+00 : f32
    %6 = vector.broadcast %cst_5 : f32 to vector<8x1024xf32>
    %7 = arith.maximumf %5, %6 : vector<8x1024xf32>
    %cst_6 = arith.constant dense<0.000000e+00> : vector<1024xf32>
    %8 = vector.multi_reduction <add>, %7, %cst_6 [0] : vector<8x1024xf32> to vector<1024xf32>
    %9 = vector.shape_cast %8 : vector<1024xf32> to vector<1x1024xf32>
    %cst_7 = arith.constant 8.000000e+00 : f32
    %10 = vector.broadcast %cst_7 : f32 to vector<1x1024xf32>
    %11 = arith.divf %9, %10 : vector<1x1024xf32>
    %12 = vector.broadcast %11 : vector<1x1024xf32> to vector<8x1024xf32>
    %13 = arith.subf %7, %12 : vector<8x1024xf32>
    %14 = arith.mulf %13, %13 : vector<8x1024xf32>
    %cst_8 = arith.constant dense<0.000000e+00> : vector<1024xf32>
    %15 = vector.multi_reduction <add>, %14, %cst_8 [0] : vector<8x1024xf32> to vector<1024xf32>
    %16 = vector.shape_cast %15 : vector<1024xf32> to vector<1x1024xf32>
    %cst_9 = arith.constant 8.000000e+00 : f32
    %17 = vector.broadcast %cst_9 : f32 to vector<1x1024xf32>
    %18 = arith.divf %16, %17 : vector<1x1024xf32>
    %c0_10 = arith.constant 0 : index
    %c0_11 = arith.constant 0 : index
    %19 = vector.load %arg4[%c0_10, %c0_11] : memref<1x1024xf32, #tpu.memory_space<vmem>>, vector<1x1024xf32>
    %cst_12 = arith.constant 9.99999974E-6 : f32
    %20 = vector.broadcast %cst_12 : f32 to vector<1x1024xf32>
    %21 = arith.addf %18, %20 : vector<1x1024xf32>
    %22 = math.rsqrt %21 : vector<1x1024xf32>
    %23 = arith.mulf %19, %22 : vector<1x1024xf32>
    %c0_13 = arith.constant 0 : index
    %c0_14 = arith.constant 0 : index
    %24 = vector.load %arg5[%c0_13, %c0_14] : memref<1x1024xf32, #tpu.memory_space<vmem>>, vector<1x1024xf32>
    %25 = arith.mulf %11, %23 : vector<1x1024xf32>
    %26 = arith.subf %24, %25 : vector<1x1024xf32>
    %27 = vector.broadcast %23 : vector<1x1024xf32> to vector<8x1024xf32>
    %28 = arith.mulf %7, %27 : vector<8x1024xf32>
    %29 = vector.broadcast %26 : vector<1x1024xf32> to vector<8x1024xf32>
    %30 = arith.addf %28, %29 : vector<8x1024xf32>
    %c0_15 = arith.constant 0 : index
    %c0_16 = arith.constant 0 : index
    %31 = vector.load %arg6[%c0_15, %c0_16] : memref<8x1024xf32, #tpu.memory_space<vmem>>, vector<8x1024xf32>
    tpu.vector_store %arg6[%c0_15, %c0_16], %30 {strides = array<i32>} : memref<8x1024xf32, #tpu.memory_space<vmem>>, vector<8x1024xf32>,
    return
  }
  func.func @transform_0(%arg0: i32) -> (i32, i32) {
    %c0_i32 = arith.constant 0 : i32
    %c0_i32_0 = arith.constant 0 : i32
    %c0_i32_1 = arith.constant 0 : i32
    return %c0_i32, %c0_i32_0 : i32, i32
  }
  func.func @transform_1(%arg0: i32) -> (i32, i32) {
    %c0_i32 = arith.constant 0 : i32
    %c0_i32_0 = arith.constant 0 : i32
    return %c0_i32, %arg0 : i32, i32
  }
  func.func @transform_2(%arg0: i32) -> (i32, i32) {
    %c0_i32 = arith.constant 0 : i32
    %c0_i32_0 = arith.constant 0 : i32
    return %c0_i32, %arg0 : i32, i32
  }
  func.func @transform_3(%arg0: i32) -> (i32, i32) {
    %c0_i32 = arith.constant 0 : i32
    %c0_i32_0 = arith.constant 0 : i32
    return %c0_i32, %arg0 : i32, i32
  }
  func.func @transform_4(%arg0: i32) -> (i32, i32) {
    %c0_i32 = arith.constant 0 : i32
    %c0_i32_0 = arith.constant 0 : i32
    return %c0_i32, %arg0 : i32, i32
  }
  func.func @transform_5(%arg0: i32) -> (i32, i32) {
    %c0_i32 = arith.constant 0 : i32
    %c0_i32_0 = arith.constant 0 : i32
    return %c0_i32, %arg0 : i32, i32
  }
}

</mosaic_0001>

<bundles_post_ra>
// kernel: linear_block.1
= control target key start
LH: loop header
LB: loop body
LE: loop exit
PB: predicated region body
PF: predicated region fallthrough
CT: control target
= control target key end

     0   :  { %10 = vsyncpa [#allocation3], 0  ;;  %s3273_s0 = inlined_call_operand.vmem [shape: bf16[8,384], index: 0, kind: input, shape index: {}]   ;;  %s3274_s1 = inlined_call_operand.hbm [shape: bf16[384,1024], index: 1, kind: input, shape index: {}]   ;;  %s3275_s2 = inlined_call_operand.vmem [shape: f32[1,1024], index: 2, kind: input, shape index: {}]   ;;  %s3276_s3 = inlined_call_operand.vmem [shape: f32[1,1024], index: 3, kind: input, shape index: {}]   ;;  %s3277_s4 = inlined_call_operand.vmem [shape: f32[1,1024], index: 4, kind: input, shape index: {}]   ;;  %s3278_s5 = inlined_call_operand.hbm [shape: f32[8,1024], index: 5, kind: output, shape index: {}]  }
   0x1   :  { %11 = vsyncpa [#allocation4], 0  ;;  %s18_s20 = sshll.u32 %s3274_s1, 4  ;;  %s2938_s21 = smov [#allocation2]   ;;  %s19_s20 = int_to_ptr.hbm [resolvable:$true] %s18_s20 }
   0x2   :  { %s20_s22 = sshll.u32 %s2938_s21, 4  ;;  %s2939_s23 = smov 512   ;;  %s21_s22 = int_to_ptr.vmem [resolvable:$true] %s20_s22 }
   0x3   :  { %s2940_s24 = smov 32  }
   0x4   :  { %26 = dma.hbm_to_vmem [thread:$0]  %s19_s20, 24576, %s21_s22, [#allocation3], %s2939_s23, %s2939_s23, %s2940_s24  }
   0x5   :  { %2934 = dma.done.wait [#allocation3], 24576  }
   0x6   :  { %2935 = vsyncadd [#allocation3], 4294942720  ;;  %v2129_v0 = vld [vmem:[#allocation2 + $0x1c0] sm:$0xf]  ;;  %v2727_v9 = vld [vmem:[#allocation2 + $0x1c4] sm:$0xf] }
   0x7   :  { %v2731_v1 = vld [vmem:[#allocation2 + $0x1dc] sm:$0xf0]  ;;  %v2131_v10 = vld [vmem:[#allocation2 + $0x1e0] sm:$0xf0]  ;;  %s1893_s9 = sshll.u32 %s3278_s5, 4  ;;  %s1894_s9 = int_to_ptr.hbm [resolvable:$true] %s1893_s9 }
   0x8   :  { %v2385_v2 = vld [vmem:[#allocation2 + $0x3c0] sm:$0xf]  ;;  %v2130_v3 = vor.u32 %v2731_v1, %v2129_v0  ;;  %v2134_v12 = vor.u32 %v2727_v9, %v2131_v10  ;;  %v2719_v20 = vld [vmem:[#allocation2 + $0x184] sm:$0xf] }
   0x9   :  { %v2795_v4 = vld [vmem:[#allocation2 + $0x3dc] sm:$0xf0]  ;;  %v2099_v22 = vld [vmem:[#allocation2 + $0x1a0] sm:$0xf0] }
   0xa   :  { %v2641_v5 = vld [vmem:[#allocation2 + $0x5c0] sm:$0xf]  ;;  %v2386_v7 = vor.u32 %v2795_v4, %v2385_v2  ;;  %1220 = vmatpush.bf16.msra.mxu0 %v2130_v3  ;;  %1259 = vmatpush.bf16.msra.mxu3 %v2134_v12  ;;  %v2102_v25 = vor.u32 %v2719_v20, %v2099_v22  ;;  %v2711_v31 = vld [vmem:[#allocation2 + $0x144] sm:$0xf] }
   0xb   :  { %v2859_v6 = vld [vmem:[#allocation2 + $0x5dc] sm:$0xf0]  ;;  %v2067_v32 = vld [vmem:[#allocation2 + $0x160] sm:$0xf0] }
   0xc   :  { %v2642_v8 = vor.u32 %v2859_v6, %v2641_v5  ;;  %v2097_v11 = vld [vmem:[#allocation2 + $0x180] sm:$0xf]  ;;  %1233 = vmatpush.bf16.msra.mxu1 %v2386_v7  ;;  %v2070_v38 = vor.u32 %v2711_v31, %v2067_v32  ;;  %v2703_v42 = vld [vmem:[#allocation2 + $0x104] sm:$0xf] }
   0xd   :  { %v2723_v13 = vld [vmem:[#allocation2 + $0x19c] sm:$0xf0]  ;;  %v2035_v43 = vld [vmem:[#allocation2 + $0x120] sm:$0xf0] }
   0xe   :  { %v2353_v14 = vld [vmem:[#allocation2 + $0x380] sm:$0xf]  ;;  %1246 = vmatpush.bf16.msra.mxu2 %v2642_v8  ;;  %v2098_v16 = vor.u32 %v2723_v13, %v2097_v11  ;;  %1260 = vmatpush.bf16.msra.mxu3 %v2102_v25  ;;  %v2038_v50 = vor.u32 %v2703_v42, %v2035_v43  ;;  %v2695_v54 = vld [vmem:[#allocation2 + $0xc4] sm:$0xf]  ;;  %v38_v25 = vld [vmem:[%s3273_s0 + $0x8] sm:$0xf] }
   0xf   :  { %v2787_v15 = vld [vmem:[#allocation2 + $0x39c] sm:$0xf0]  ;;  %v2003_v55 = vld [vmem:[#allocation2 + $0xe0] sm:$0xf0] }
  0x10   :  { %v2354_v17 = vor.u32 %v2787_v15, %v2353_v14  ;;  %v2609_v18 = vld [vmem:[#allocation2 + $0x580] sm:$0xf]  ;;  %1221 = vmatpush.bf16.msra.mxu0 %v2098_v16  ;;  %v2006_v62 = vor.u32 %v2695_v54, %v2003_v55  ;;  %v2687_v2 = vld [vmem:[#allocation2 + $0x84] sm:$0xf]  ;;  %v2105_v54 = vld [vmem:[#allocation2 + $0x188] sm:$0xf] }
  0x11   :  { %v2851_v19 = vld [vmem:[#allocation2 + $0x59c] sm:$0xf0]  ;;  %v1971_v3 = vld [vmem:[#allocation2 + $0xa0] sm:$0xf0]  ;;  %v2724_v55 = vld [vmem:[#allocation2 + $0x1a4] sm:$0xf0] }
  0x12   :  { %v2610_v21 = vor.u32 %v2851_v19, %v2609_v18  ;;  %v2065_v23 = vld [vmem:[#allocation2 + $0x140] sm:$0xf]  ;;  %1234 = vmatpush.bf16.msra.mxu1 %v2354_v17  ;;  %1261 = vmatpush.bf16.msra.mxu3 %v2070_v38  ;;  %v1974_v10 = vor.u32 %v2687_v2, %v1971_v3  ;;  %v2679_v14 = vld [vmem:[#allocation2 + $0x44] sm:$0xf] }
  0x13   :  { %v2715_v24 = vld [vmem:[#allocation2 + $0x15c] sm:$0xf0]  ;;  %v1939_v15 = vld [vmem:[#allocation2 + $0x60] sm:$0xf0] }
  0x14   :  { %v2321_v26 = vld [vmem:[#allocation2 + $0x340] sm:$0xf]  ;;  %v2066_v29 = vor.u32 %v2715_v24, %v2065_v23  ;;  %1247 = vmatpush.bf16.msra.mxu2 %v2610_v21  ;;  %v2387_v31 = vld [vmem:[#allocation2 + $0x3e0] sm:$0xf0] }
  0x15   :  { %v2779_v27 = vld [vmem:[#allocation2 + $0x35c] sm:$0xf0]  ;;  %v2855_v32 = vld [vmem:[#allocation2 + $0x5c4] sm:$0xf] }
  0x16   :  { %v2577_v28 = vld [vmem:[#allocation2 + $0x540] sm:$0xf]  ;;  %v2322_v33 = vor.u32 %v2779_v27, %v2321_v26  ;;  %1222 = vmatpush.bf16.msra.mxu0 %v2066_v29  ;;  %1262 = vmatpush.bf16.msra.mxu3 %v2038_v50  ;;  %v1942_v26 = vor.u32 %v2679_v14, %v1939_v15  ;;  %v2671_v27 = vld [vmem:[#allocation2 + $0x4] sm:$0xf] }
  0x17   :  { %v2843_v30 = vld [vmem:[#allocation2 + $0x55c] sm:$0xf0]  ;;  %v2847_v50 = vld [vmem:[#allocation2 + $0x584] sm:$0xf] }
  0x18   :  { %v2578_v34 = vor.u32 %v2843_v30, %v2577_v28  ;;  %v2033_v35 = vld [vmem:[#allocation2 + $0x100] sm:$0xf]  ;;  %1235 = vmatpush.bf16.msra.mxu1 %v2322_v33  ;;  %v1907_v28 = vld [vmem:[#allocation2 + $0x20] sm:$0xf0] }
  0x19   :  { %v2707_v36 = vld [vmem:[#allocation2 + $0x11c] sm:$0xf0]  ;;  %v2791_v30 = vld [vmem:[#allocation2 + $0x3c4] sm:$0xf] }
  0x1a   :  { %v2289_v37 = vld [vmem:[#allocation2 + $0x300] sm:$0xf]  ;;  %v2034_v44 = vor.u32 %v2707_v36, %v2033_v35  ;;  %1248 = vmatpush.bf16.msra.mxu2 %v2578_v34  ;;  %1263 = vmatpush.bf16.msra.mxu3 %v2006_v62  ;;  %v2643_v34 = vld [vmem:[#allocation2 + $0x5e0] sm:$0xf0]  ;;  %v2137_v35 = vld [vmem:[#allocation2 + $0x1c8] sm:$0xf]  ;;  %v2106_v62 = vor.u32 %v2724_v55, %v2105_v54 }
  0x1b   :  { %v2771_v39 = vld [vmem:[#allocation2 + $0x31c] sm:$0xf0]  ;;  %v2732_v36 = vld [vmem:[#allocation2 + $0x1e4] sm:$0xf0]  ;;  %v2579_v3 = vld [vmem:[#allocation2 + $0x560] sm:$0xf0] }
  0x1c   :  { %v2545_v40 = vld [vmem:[#allocation2 + $0x500] sm:$0xf]  ;;  %v2290_v45 = vor.u32 %v2771_v39, %v2289_v37  ;;  %1223 = vmatpush.bf16.msra.mxu0 %v2034_v44  ;;  %v253_v37 = vunpack.c.l.b16 %v38_v25  ;;  %v1910_v44 = vor.u32 %v2671_v27, %v1907_v28  ;;  %v2547_v15 = vld [vmem:[#allocation2 + $0x520] sm:$0xf0]  ;;  %v2009_v28 = vld [vmem:[#allocation2 + $0xc8] sm:$0xf] }
  0x1d   :  { %v2835_v41 = vld [vmem:[#allocation2 + $0x51c] sm:$0xf0]  ;;  %v2823_v25 = vld [vmem:[#allocation2 + $0x4c4] sm:$0xf]  ;;  %v2684_v54 = vld [vmem:[#allocation2 + $0x64] sm:$0xf0] }
  0x1e   :  { %v2546_v46 = vor.u32 %v2835_v41, %v2545_v40  ;;  %v2001_v47 = vld [vmem:[#allocation2 + $0xc0] sm:$0xf]  ;;  %1236 = vmatpush.bf16.msra.mxu1 %v2290_v45  ;;  %1264 = vmatpush.bf16.msra.mxu3 %v1974_v10  ;;  %v2393_v40 = vld [vmem:[#allocation2 + $0x3c8] sm:$0xf]  ;;  %v2390_v45 = vor.u32 %v2791_v30, %v2387_v31  ;;  %v2515_v27 = vld [vmem:[#allocation2 + $0x4e0] sm:$0xf0] }
  0x1f   :  { %v2699_v48 = vld [vmem:[#allocation2 + $0xdc] sm:$0xf0]  ;;  %v2796_v41 = vld [vmem:[#allocation2 + $0x3e4] sm:$0xf0] }
  0x20   :  { %v2257_v49 = vld [vmem:[#allocation2 + $0x2c0] sm:$0xf]  ;;  %v2002_v56 = vor.u32 %v2699_v48, %v2001_v47  ;;  %1249 = vmatpush.bf16.msra.mxu2 %v2546_v46  ;;  %v2646_v46 = vor.u32 %v2855_v32, %v2643_v34  ;;  %v2138_v47 = vor.u32 %v2732_v36, %v2137_v35  ;;  %v2783_v48 = vld [vmem:[#allocation2 + $0x384] sm:$0xf]  ;;  %v2265_v30 = vld [vmem:[#allocation2 + $0x2c8] sm:$0xf] }
  0x21   :  { %v2763_v51 = vld [vmem:[#allocation2 + $0x2dc] sm:$0xf0]  ;;  %v2764_v31 = vld [vmem:[#allocation2 + $0x2e4] sm:$0xf0]  ;;  %v2751_v35 = vld [vmem:[#allocation2 + $0x284] sm:$0xf] }
  0x22   :  { %v2513_v52 = vld [vmem:[#allocation2 + $0x4c0] sm:$0xf]  ;;  %v2258_v57 = vor.u32 %v2763_v51, %v2257_v49  ;;  %1224 = vmatpush.bf16.msra.mxu0 %v2002_v56  ;;  %1265 = vmatpush.bf16.msra.mxu3 %v1942_v26  ;;  %v2355_v49 = vld [vmem:[#allocation2 + $0x3a0] sm:$0xf0]  ;;  %v2394_v51 = vor.u32 %v2796_v41, %v2393_v40  ;;  %v1977_v40 = vld [vmem:[#allocation2 + $0x88] sm:$0xf] }
  0x23   :  { %v2827_v53 = vld [vmem:[#allocation2 + $0x4dc] sm:$0xf0]  ;;  %v2227_v36 = vld [vmem:[#allocation2 + $0x2a0] sm:$0xf0]  ;;  %v2692_v41 = vld [vmem:[#allocation2 + $0xa4] sm:$0xf0] }
  0x24   :  { %v2514_v58 = vor.u32 %v2827_v53, %v2513_v52  ;;  %v1969_v59 = vld [vmem:[#allocation2 + $0x80] sm:$0xf]  ;;  %1237 = vmatpush.bf16.msra.mxu1 %v2258_v57  ;;  %v2982_v52 = vpack.c.b16 %v253_v37, %v253_v37  ;;  %v2611_v53 = vld [vmem:[#allocation2 + $0x5a0] sm:$0xf0]  ;;  %v2361_v57 = vld [vmem:[#allocation2 + $0x388] sm:$0xf] }
  0x25   :  { %v2691_v60 = vld [vmem:[#allocation2 + $0x9c] sm:$0xf0]  ;;  %v2815_v37 = vld [vmem:[#allocation2 + $0x484] sm:$0xf]  ;;  %v2201_v55 = vld [vmem:[#allocation2 + $0x248] sm:$0xf] }
  0x26   :  { %v2225_v61 = vld [vmem:[#allocation2 + $0x280] sm:$0xf]  ;;  %v1970_v4 = vor.u32 %v2691_v60, %v1969_v59  ;;  %1250 = vmatpush.bf16.msra.mxu2 %v2514_v58  ;;  %v2788_v58 = vld [vmem:[#allocation2 + $0x3a4] sm:$0xf0]  ;;  %1266 = vmatpush.bf16.msra.mxu3 %v1910_v44  ;;  %v2358_v60 = vor.u32 %v2783_v48, %v2355_v49  ;;  %v2230_v44 = vor.u32 %v2751_v35, %v2227_v36  ;;  %v2195_v48 = vld [vmem:[#allocation2 + $0x260] sm:$0xf0] }
  0x27   :  { %v2755_v63 = vld [vmem:[#allocation2 + $0x29c] sm:$0xf0]  ;;  %v2362_v2 = vor.u32 %v2788_v58, %v2361_v57  ;;  %v2807_v49 = vld [vmem:[#allocation2 + $0x444] sm:$0xf]  ;;  %v2748_v57 = vld [vmem:[#allocation2 + $0x264] sm:$0xf0] }
  0x28   :  { %v2481_v0 = vld [vmem:[#allocation2 + $0x480] sm:$0xf]  ;;  %v2226_v5 = vor.u32 %v2755_v63, %v2225_v61  ;;  %1225 = vmatpush.bf16.msra.mxu0 %v1970_v4  ;;  %v2614_v61 = vor.u32 %v2847_v50, %v2611_v53  ;;  %v2775_v63 = vld [vmem:[#allocation2 + $0x344] sm:$0xf]  ;;  %v2073_v4 = vld [vmem:[#allocation2 + $0x148] sm:$0xf] }
  0x29   :  { %v2819_v1 = vld [vmem:[#allocation2 + $0x49c] sm:$0xf0]  ;;  %v1945_v53 = vld [vmem:[#allocation2 + $0x48] sm:$0xf]  ;;  %v2712_v36 = vld [vmem:[#allocation2 + $0x14c] sm:$0xf] }
  0x2a   :  { %v2482_v6 = vor.u32 %v2819_v1, %v2481_v0  ;;  %v1937_v7 = vld [vmem:[#allocation2 + $0x40] sm:$0xf]  ;;  %1238 = vmatpush.bf16.msra.mxu1 %v2226_v5  ;;  %v2323_v0 = vld [vmem:[#allocation2 + $0x360] sm:$0xf0]  ;;  %1311 = vmatpush.bf16.msrb.mxu3 %v2394_v51  ;;  %v2716_v5 = vld [vmem:[#allocation2 + $0x164] sm:$0xf0] }
  0x2b   :  { %v2683_v8 = vld [vmem:[#allocation2 + $0x5c] sm:$0xf0]  ;;  %v2839_v1 = vld [vmem:[#allocation2 + $0x544] sm:$0xf]  ;;  %v2074_v10 = vor.u32 %v2716_v5, %v2073_v4  ;;  %v2676_v4 = vld [vmem:[#allocation2 + $0x24] sm:$0xf0] }
  0x2c   :  { %v2193_v9 = vld [vmem:[#allocation2 + $0x240] sm:$0xf]  ;;  %v1938_v17 = vor.u32 %v2683_v8, %v1937_v7  ;;  %1251 = vmatpush.bf16.msra.mxu2 %v2482_v6  ;;  %v2329_v6 = vld [vmem:[#allocation2 + $0x348] sm:$0xf]  ;;  %v2326_v8 = vor.u32 %v2775_v63, %v2323_v0  ;;  %v2451_v51 = vld [vmem:[#allocation2 + $0x460] sm:$0xf0]  ;;  %v1946_v63 = vor.u32 %v2684_v54, %v1945_v53 }
  0x2d   :  { %v2747_v11 = vld [vmem:[#allocation2 + $0x25c] sm:$0xf0]  ;;  %v2780_v7 = vld [vmem:[#allocation2 + $0x364] sm:$0xf0]  ;;  %v2799_v0 = vld [vmem:[#allocation2 + $0x404] sm:$0xf] }
  0x2e   :  { %v2449_v12 = vld [vmem:[#allocation2 + $0x440] sm:$0xf]  ;;  %v2194_v21 = vor.u32 %v2747_v11, %v2193_v9  ;;  %1226 = vmatpush.bf16.msra.mxu0 %v1938_v17  ;;  %v2582_v9 = vor.u32 %v2839_v1, %v2579_v3  ;;  %v2767_v11 = vld [vmem:[#allocation2 + $0x304] sm:$0xf]  ;;  %1312 = vmatpush.bf16.msrb.mxu3 %v2362_v2  ;;  %v2330_v14 = vor.u32 %v2780_v7, %v2329_v6  ;;  %v2708_v17 = vld [vmem:[#allocation2 + $0x124] sm:$0xf0] }
  0x2f   :  { %v2811_v13 = vld [vmem:[#allocation2 + $0x45c] sm:$0xf0]  ;;  %v2419_v1 = vld [vmem:[#allocation2 + $0x420] sm:$0xf0]  ;;  %v1913_v2 = vld [vmem:[#allocation2 + $0x8] sm:$0xf]  ;;  %v2202_v3 = vor.u32 %v2748_v57, %v2201_v55 }
  0x30   :  { %v1905_v16 = vld [vmem:[#allocation2] sm:$0xf]  ;;  %v2450_v22 = vor.u32 %v2811_v13, %v2449_v12  ;;  %1239 = vmatpush.bf16.msra.mxu1 %v2194_v21  ;;  %v2291_v12 = vld [vmem:[#allocation2 + $0x320] sm:$0xf0]  ;;  %v2169_v5 = vld [vmem:[#allocation2 + $0x208] sm:$0xf] }
  0x31   :  { %v2675_v18 = vld [vmem:[#allocation2 + $0x1c] sm:$0xf0]  ;;  %v2831_v13 = vld [vmem:[#allocation2 + $0x504] sm:$0xf]  ;;  %v2740_v6 = vld [vmem:[#allocation2 + $0x224] sm:$0xf0] }
  0x32   :  { %v2161_v19 = vld [vmem:[#allocation2 + $0x200] sm:$0xf]  ;;  %v1906_v33 = vor.u32 %v2675_v18, %v1905_v16  ;;  %1252 = vmatpush.bf16.msra.mxu2 %v2450_v22  ;;  %v2041_v16 = vld [vmem:[#allocation2 + $0x108] sm:$0xf]  ;;  %v2550_v21 = vor.u32 %v2831_v13, %v2547_v15  ;;  %1313 = vmatpush.bf16.msrb.mxu3 %v2330_v14  ;;  %v2395_v13 = vld [vmem:[#allocation2 + $0x3e8] sm:$0xf0]  ;;  %v2422_v14 = vor.u32 %v2799_v0, %v2419_v1 }
  0x33   :  { %v2739_v20 = vld [vmem:[#allocation2 + $0x21c] sm:$0xf0]  ;;  %v2297_v18 = vld [vmem:[#allocation2 + $0x308] sm:$0xf]  ;;  %v2042_v22 = vor.u32 %v2708_v17, %v2041_v16  ;;  %v1914_v15 = vor.u32 %v2676_v4, %v1913_v2  ;;  %v2856_v16 = vld [vmem:[#allocation2 + $0x5cc] sm:$0xf] }
  0x34   :  { %v2417_v23 = vld [vmem:[#allocation2 + $0x400] sm:$0xf]  ;;  %v2162_v38 = vor.u32 %v2739_v20, %v2161_v19  ;;  %1227 = vmatpush.bf16.msra.mxu0 %v1906_v33  ;;  %v2772_v19 = vld [vmem:[#allocation2 + $0x324] sm:$0xf0]  ;;  %v2294_v20 = vor.u32 %v2767_v11, %v2291_v12  ;;  %v2518_v33 = vor.u32 %v2823_v25, %v2515_v27  ;;  %v2139_v11 = vld [vmem:[#allocation2 + $0x1e8] sm:$0xf0] }
  0x35   :  { %v2803_v24 = vld [vmem:[#allocation2 + $0x41c] sm:$0xf0]  ;;  %v2298_v26 = vor.u32 %v2772_v19, %v2297_v18  ;;  %v2649_v7 = vld [vmem:[#allocation2 + $0x5c8] sm:$0xf]  ;;  %v2792_v12 = vld [vmem:[#allocation2 + $0x3cc] sm:$0xf]  ;;  %v2170_v18 = vor.u32 %v2740_v6, %v2169_v5 }
  0x36   :  { %v37_v29 = vld [vmem:[%s3273_s0] sm:$0xff]  ;;  %v2418_v39 = vor.u32 %v2803_v24, %v2417_v23  ;;  %1240 = vmatpush.bf16.msra.mxu1 %v2162_v38  ;;  %v2266_v38 = vor.u32 %v2764_v31, %v2265_v30  ;;  %v2651_v17 = vld [vmem:[#allocation2 + $0x5e8] sm:$0xf0]  ;;  %v2844_v35 = vld [vmem:[#allocation2 + $0x564] sm:$0xf0] }
  0x37   :  { %v251_v42 = vunpack.c.l.b16 %v37_v29  ;;  %v252_v43 = vunpack.c.h.b16 %v37_v29  ;;  %v2759_v23 = vld [vmem:[#allocation2 + $0x2c4] sm:$0xf]  ;;  %v2700_v29 = vld [vmem:[#allocation2 + $0xe4] sm:$0xf0]  ;;  %1314 = vmatpush.bf16.msrb.mxu3 %v2298_v26  ;;  %v2654_v25 = vor.u32 %v2856_v16, %v2651_v17  ;;  %v2107_v26 = vld [vmem:[#allocation2 + $0x1a8] sm:$0xf0] }
  0x38   :  { %1253 = vmatpush.bf16.msra.mxu2 %v2418_v39  ;;  %1272 = vmatpush.bf16.msrb.mxu0 %v2390_v45  ;;  %v2259_v24 = vld [vmem:[#allocation2 + $0x2e0] sm:$0xf0]  ;;  %v2010_v34 = vor.u32 %v2700_v29, %v2009_v28  ;;  %v2784_v27 = vld [vmem:[#allocation2 + $0x38c] sm:$0xf] }
  0x39   :  { %v2984_v56 = vpack.c.b16 %v251_v42, %v251_v42  ;;  %v2986_v59 = vpack.c.b16 %v252_v43, %v252_v43  ;;  %v2262_v32 = vor.u32 %v2759_v23, %v2259_v24  ;;  %v2483_v39 = vld [vmem:[#allocation2 + $0x4a0] sm:$0xf0]  ;;  %v2233_v42 = vld [vmem:[#allocation2 + $0x288] sm:$0xf]  ;;  %v2720_v24 = vld [vmem:[#allocation2 + $0x18c] sm:$0xf] }
  0x3a   :  { %1285 = vmatpush.bf16.msrb.mxu1 %v2646_v46  ;;  %v2756_v43 = vld [vmem:[#allocation2 + $0x2a4] sm:$0xf0]  ;;  %v2486_v45 = vor.u32 %v2815_v37, %v2483_v39  ;;  %v1978_v46 = vor.u32 %v2692_v41, %v1977_v40  ;;  %v2363_v28 = vld [vmem:[#allocation2 + $0x3a8] sm:$0xf0] }
  0x3b   :  { %1254 = vmatmul.bf16.vlgmr.msra.gmra.mxu2 %v2982_v52  ;;  %1228 = vmatmul.bf16.vlgmr.msra.gmra.mxu0 %v2984_v56  ;;  %v2234_v50 = vor.u32 %v2756_v43, %v2233_v42  ;;  %v2852_v23 = vld [vmem:[#allocation2 + $0x5a4] sm:$0xf0]  ;;  %v2848_v29 = vld [vmem:[#allocation2 + $0x58c] sm:$0xf] }
  0x3c   :  { %1298 = vmatpush.bf16.msrb.mxu2 %v2138_v47  ;;  %1241 = vmatmul.bf16.vlgmr.msra.gmra.mxu1 %v2986_v59  ;;  %v2743_v47 = vld [vmem:[#allocation2 + $0x244] sm:$0xf]  ;;  %v2619_v30 = vld [vmem:[#allocation2 + $0x5a8] sm:$0xf0] }
  0x3d   :  { %1273 = vmatpush.bf16.msrb.mxu0 %v2358_v60  ;;  %1267 = vmatmul.bf16.vlgmr.msra.gmra.mxu3 %v2984_v56  ;;  %v2198_v58 = vor.u32 %v2743_v47, %v2195_v48  ;;  %v2735_v60 = vld [vmem:[#allocation2 + $0x204] sm:$0xf]  ;;  %v2622_v37 = vor.u32 %v2848_v29, %v2619_v30  ;;  %v2776_v39 = vld [vmem:[#allocation2 + $0x34c] sm:$0xf]  ;;  %v2836_v47 = vld [vmem:[#allocation2 + $0x524] sm:$0xf0] }
  0x3e   :  { %1286 = vmatpush.bf16.msrb.mxu1 %v2614_v61  ;;  %1315 = vmatpush.bf16.msrb.mxu3 %v2266_v38  ;;  %v2163_v61 = vld [vmem:[#allocation2 + $0x220] sm:$0xf0]  ;;  %v2075_v38 = vld [vmem:[#allocation2 + $0x168] sm:$0xf0] }
  0x3f   :  { %v2331_v40 = vld [vmem:[#allocation2 + $0x368] sm:$0xf0] }
  0x40   :  { %1299 = vmatpush.bf16.msrb.mxu2 %v2106_v62  ;;  %v2454_v62 = vor.u32 %v2807_v49, %v2451_v51  ;;  %v2840_v41 = vld [vmem:[#allocation2 + $0x54c] sm:$0xf] }
  0x41   :  { %1274 = vmatpush.bf16.msrb.mxu0 %v2326_v8  ;;  %v2860_v8 = vld [vmem:[#allocation2 + $0x5e4] sm:$0xf0]  ;;  %v2587_v42 = vld [vmem:[#allocation2 + $0x568] sm:$0xf0] }
  0x42   :  { %1287 = vmatpush.bf16.msrb.mxu1 %v2582_v9  ;;  %1316 = vmatpush.bf16.msrb.mxu3 %v2234_v50  ;;  %v2728_v9 = vld [vmem:[#allocation2 + $0x1cc] sm:$0xf]  ;;  %v2650_v19 = vor.u32 %v2860_v8, %v2649_v7  ;;  %v2590_v49 = vor.u32 %v2840_v41, %v2587_v42  ;;  %v2145_v42 = vld [vmem:[#allocation2 + $0x1d0] sm:$0xf] }
  0x43   :  { %v2704_v48 = vld [vmem:[#allocation2 + $0x10c] sm:$0xf] }
  0x44   :  { %1300 = vmatpush.bf16.msrb.mxu2 %v2074_v10  ;;  %v2166_v10 = vor.u32 %v2735_v60, %v2163_v61  ;;  %v2043_v50 = vld [vmem:[#allocation2 + $0x128] sm:$0xf0]  ;;  %v2521_v61 = vld [vmem:[#allocation2 + $0x4c8] sm:$0xf] }
  0x45   :  { %1275 = vmatpush.bf16.msrb.mxu0 %v2294_v20  ;;  %v2142_v20 = vor.u32 %v2728_v9, %v2139_v11  ;;  %v2768_v51 = vld [vmem:[#allocation2 + $0x30c] sm:$0xf]  ;;  %v2489_v9 = vld [vmem:[#allocation2 + $0x488] sm:$0xf] }
  0x46   :  { %1288 = vmatpush.bf16.msrb.mxu1 %v2550_v21  ;;  %1317 = vmatpush.bf16.msrb.mxu3 %v2202_v3  ;;  %v2398_v21 = vor.u32 %v2792_v12, %v2395_v13  ;;  %v2299_v53 = vld [vmem:[#allocation2 + $0x328] sm:$0xf0] }
  0x47   :  { %v2832_v54 = vld [vmem:[#allocation2 + $0x50c] sm:$0xf]  ;;  %v2302_v60 = vor.u32 %v2768_v51, %v2299_v53  ;;  %v2729_v51 = vld [vmem:[#allocation2 + $0x1d4] sm:$0xf] }
  0x48   :  { %1301 = vmatpush.bf16.msrb.mxu2 %v2042_v22  ;;  %v2617_v22 = vld [vmem:[#allocation2 + $0x588] sm:$0xf]  ;;  %v2555_v55 = vld [vmem:[#allocation2 + $0x528] sm:$0xf0]  ;;  %v2147_v53 = vld [vmem:[#allocation2 + $0x1f0] sm:$0xf0] }
  0x49   :  { %1276 = vmatpush.bf16.msrb.mxu0 %v2262_v32  ;;  %v2618_v31 = vor.u32 %v2852_v23, %v2617_v22  ;;  %v2110_v32 = vor.u32 %v2720_v24, %v2107_v26  ;;  %v2558_v0 = vor.u32 %v2832_v54, %v2555_v55  ;;  %v2011_v1 = vld [vmem:[#allocation2 + $0xe8] sm:$0xf0]  ;;  %v2812_v22 = vld [vmem:[#allocation2 + $0x464] sm:$0xf0] }
  0x4a   :  { %1289 = vmatpush.bf16.msrb.mxu1 %v2518_v33  ;;  %1318 = vmatpush.bf16.msrb.mxu3 %v2170_v18  ;;  %v2366_v33 = vor.u32 %v2784_v27, %v2363_v28  ;;  %v2760_v2 = vld [vmem:[#allocation2 + $0x2cc] sm:$0xf] }
  0x4b   :  { %v2267_v3 = vld [vmem:[#allocation2 + $0x2e8] sm:$0xf0] }
  0x4c   :  { %1302 = vmatpush.bf16.msrb.mxu2 %v2010_v34  ;;  %v2585_v34 = vld [vmem:[#allocation2 + $0x548] sm:$0xf]  ;;  %v2824_v4 = vld [vmem:[#allocation2 + $0x4cc] sm:$0xf]  ;;  %v2270_v8 = vor.u32 %v2760_v2, %v2267_v3  ;;  %v2853_v2 = vld [vmem:[#allocation2 + $0x5ac] sm:$0xf0] }
  0x4d   :  { %1277 = vmatpush.bf16.msrb.mxu0 %v2230_v44  ;;  %v2586_v43 = vor.u32 %v2844_v35, %v2585_v34  ;;  %1319 = vmatmul.bf16.vlgmr.msrb.gmra.mxu3 %v2986_v59  ;;  %v2078_v44 = vor.u32 %v2712_v36, %v2075_v38  ;;  %v2523_v5 = vld [vmem:[#allocation2 + $0x4e8] sm:$0xf0]  ;;  %v2721_v3 = vld [vmem:[#allocation2 + $0x194] sm:$0xf] }
  0x4e   :  { %1290 = vmatpush.bf16.msrb.mxu1 %v2486_v45  ;;  %1363 = vmatpush.bf16.msra.mxu3 %v2654_v25  ;;  %v2334_v45 = vor.u32 %v2776_v39, %v2331_v40  ;;  %v2688_v11 = vld [vmem:[#allocation2 + $0x8c] sm:$0xf]  ;;  %v2526_v12 = vor.u32 %v2824_v4, %v2523_v5  ;;  %v2115_v4 = vld [vmem:[#allocation2 + $0x1b0] sm:$0xf0] }
  0x4f   :  { %v1979_v13 = vld [vmem:[#allocation2 + $0xa8] sm:$0xf0] }
  0x50   :  { %1303 = vmatpush.bf16.msrb.mxu2 %v1978_v46  ;;  %v2553_v46 = vld [vmem:[#allocation2 + $0x508] sm:$0xf]  ;;  %v2816_v16 = vld [vmem:[#allocation2 + $0x48c] sm:$0xf] }
  0x51   :  { %1278 = vmatpush.bf16.msrb.mxu0 %v2198_v58  ;;  %v2554_v57 = vor.u32 %v2836_v47, %v2553_v46  ;;  %v2046_v58 = vor.u32 %v2704_v48, %v2043_v50  ;;  %v2491_v17 = vld [vmem:[#allocation2 + $0x4a8] sm:$0xf0]  ;;  %v2797_v46 = vld [vmem:[#allocation2 + $0x3ec] sm:$0xf0] }
  0x52   :  { %1291 = vmatpush.bf16.msrb.mxu1 %v2454_v62  ;;  %1364 = vmatpush.bf16.msra.mxu3 %v2622_v37  ;;  %v2828_v62 = vld [vmem:[#allocation2 + $0x4e4] sm:$0xf0]  ;;  %v2680_v23 = vld [vmem:[#allocation2 + $0x4c] sm:$0xf]  ;;  %v2494_v24 = vor.u32 %v2816_v16, %v2491_v17  ;;  %v2657_v47 = vld [vmem:[#allocation2 + $0x5d0] sm:$0xf] }
  0x53   :  { %v2522_v6 = vor.u32 %v2828_v62, %v2521_v61  ;;  %v1947_v25 = vld [vmem:[#allocation2 + $0x68] sm:$0xf0]  ;;  %v2861_v48 = vld [vmem:[#allocation2 + $0x5ec] sm:$0xf0]  ;;  %v2083_v16 = vld [vmem:[#allocation2 + $0x170] sm:$0xf0] }
  0x54   :  { %1304 = vmatpush.bf16.msrb.mxu2 %v1946_v63  ;;  %v2696_v63 = vld [vmem:[#allocation2 + $0xcc] sm:$0xf]  ;;  %v2725_v61 = vld [vmem:[#allocation2 + $0x1ac] sm:$0xf0] }
  0x55   :  { %1279 = vmatpush.bf16.msrb.mxu0 %v2166_v10  ;;  %v2014_v7 = vor.u32 %v2696_v63, %v2011_v1  ;;  %v2820_v10 = vld [vmem:[#allocation2 + $0x4a4] sm:$0xf0]  ;;  %v2744_v26 = vld [vmem:[#allocation2 + $0x24c] sm:$0xf]  ;;  %v2369_v62 = vld [vmem:[#allocation2 + $0x390] sm:$0xf]  ;;  %v2150_v63 = vor.u32 %v2729_v51, %v2147_v53 }
  0x56   :  { %1292 = vmatpush.bf16.msrb.mxu1 %v2422_v14  ;;  %1365 = vmatpush.bf16.msra.mxu3 %v2590_v49  ;;  %v2752_v14 = vld [vmem:[#allocation2 + $0x28c] sm:$0xf]  ;;  %v2490_v18 = vor.u32 %v2820_v10, %v2489_v9  ;;  %v2625_v1 = vld [vmem:[#allocation2 + $0x590] sm:$0xf]  ;;  %v2689_v51 = vld [vmem:[#allocation2 + $0x94] sm:$0xf] }
  0x57   :  { %v2203_v27 = vld [vmem:[#allocation2 + $0x268] sm:$0xf0]  ;;  %v2717_v9 = vld [vmem:[#allocation2 + $0x16c] sm:$0xf0]  ;;  %v1987_v53 = vld [vmem:[#allocation2 + $0xb0] sm:$0xf0] }
  0x58   :  { %1305 = vmatpush.bf16.msrb.mxu2 %v1914_v15  ;;  %1280 = vmatmul.bf16.vlgmr.msrb.gmra.mxu0 %v2986_v59  ;;  %v2235_v15 = vld [vmem:[#allocation2 + $0x2a8] sm:$0xf0]  ;;  %v2206_v34 = vor.u32 %v2744_v26, %v2203_v27  ;;  %v2337_v10 = vld [vmem:[#allocation2 + $0x350] sm:$0xf]  ;;  %v2705_v27 = vld [vmem:[#allocation2 + $0x114] sm:$0xf] }
  0x59   :  { %1324 = vmatpush.bf16.msra.mxu0 %v2650_v19  ;;  %1293 = vmatmul.bf16.vlgmr.msrb.gmra.mxu1 %v2982_v52  ;;  %v1982_v19 = vor.u32 %v2688_v11, %v1979_v13  ;;  %v2808_v28 = vld [vmem:[#allocation2 + $0x44c] sm:$0xf]  ;;  %v2118_v11 = vor.u32 %v2721_v3, %v2115_v4  ;;  %v2593_v13 = vld [vmem:[#allocation2 + $0x550] sm:$0xf]  ;;  %v1955_v3 = vld [vmem:[#allocation2 + $0x70] sm:$0xf0] }
  0x5a   :  { %1337 = vmatpush.bf16.msra.mxu1 %v2142_v20  ;;  %1366 = vmatpush.bf16.msra.mxu3 %v2558_v0  ;;  %v2238_v20 = vor.u32 %v2752_v14, %v2235_v15  ;;  %v2459_v29 = vld [vmem:[#allocation2 + $0x468] sm:$0xf0]  ;;  %v2789_v0 = vld [vmem:[#allocation2 + $0x3ac] sm:$0xf0]  ;;  %v2713_v15 = vld [vmem:[#allocation2 + $0x154] sm:$0xf] }
  0x5b   :  { %1306 = vmatmul.bf16.vlgmr.msrb.gmra.mxu2 %v2984_v56  ;;  %v2672_v35 = vld [vmem:[#allocation2 + $0xc] sm:$0xf]  ;;  %v2462_v38 = vor.u32 %v2808_v28, %v2459_v29  ;;  %v2845_v14 = vld [vmem:[#allocation2 + $0x56c] sm:$0xf0]  ;;  %v2051_v28 = vld [vmem:[#allocation2 + $0x130] sm:$0xf0] }
  0x5c   :  { %1350 = vmatpush.bf16.msra.mxu2 %v2398_v21  ;;  %v2457_v21 = vld [vmem:[#allocation2 + $0x448] sm:$0xf]  ;;  %v1915_v36 = vld [vmem:[#allocation2 + $0x28] sm:$0xf0]  ;;  %v2837_v26 = vld [vmem:[#allocation2 + $0x52c] sm:$0xf0] }
  0x5d   :  { %1325 = vmatpush.bf16.msra.mxu0 %v2618_v31  ;;  %v2458_v30 = vor.u32 %v2812_v22, %v2457_v21  ;;  %v2425_v31 = vld [vmem:[#allocation2 + $0x408] sm:$0xf]  ;;  %v2736_v37 = vld [vmem:[#allocation2 + $0x20c] sm:$0xf]  ;;  %v1918_v49 = vor.u32 %v2672_v35, %v1915_v36  ;;  %v2709_v21 = vld [vmem:[#allocation2 + $0x12c] sm:$0xf0]  ;;  %v2054_v35 = vor.u32 %v2705_v27, %v2051_v28 }
  0x5e   :  { %1338 = vmatpush.bf16.msra.mxu1 %v2110_v32  ;;  %1367 = vmatpush.bf16.msra.mxu3 %v2526_v12  ;;  %v2804_v32 = vld [vmem:[#allocation2 + $0x424] sm:$0xf0]  ;;  %v2171_v39 = vld [vmem:[#allocation2 + $0x228] sm:$0xf0]  ;;  %v2781_v12 = vld [vmem:[#allocation2 + $0x36c] sm:$0xf0] }
  0x5f   :  { %v2800_v40 = vld [vmem:[#allocation2 + $0x40c] sm:$0xf]  ;;  %v2174_v50 = vor.u32 %v2736_v37, %v2171_v39  ;;  %v2305_v22 = vld [vmem:[#allocation2 + $0x310] sm:$0xf]  ;;  %v2697_v39 = vld [vmem:[#allocation2 + $0xd4] sm:$0xf] }
  0x60   :  { %1351 = vmatpush.bf16.msra.mxu2 %v2366_v33  ;;  %v1950_v33 = vor.u32 %v2680_v23, %v1947_v25  ;;  %v2427_v41 = vld [vmem:[#allocation2 + $0x428] sm:$0xf0]  ;;  %v2086_v23 = vor.u32 %v2713_v15, %v2083_v16  ;;  %v2561_v25 = vld [vmem:[#allocation2 + $0x510] sm:$0xf]  ;;  %v1923_v15 = vld [vmem:[#allocation2 + $0x30] sm:$0xf0] }
  0x61   :  { %1326 = vmatpush.bf16.msra.mxu0 %v2586_v43  ;;  %v2733_v43 = vld [vmem:[#allocation2 + $0x1ec] sm:$0xf0]  ;;  %v2430_v54 = vor.u32 %v2800_v40, %v2427_v41  ;;  %v2019_v40 = vld [vmem:[#allocation2 + $0xf0] sm:$0xf0] }
  0x62   :  { %1339 = vmatpush.bf16.msra.mxu1 %v2078_v44  ;;  %1368 = vmatpush.bf16.msra.mxu3 %v2494_v24  ;;  %v2401_v44 = vld [vmem:[#allocation2 + $0x3d0] sm:$0xf]  ;;  %v2146_v55 = vor.u32 %v2733_v43, %v2145_v42  ;;  %v2793_v16 = vld [vmem:[#allocation2 + $0x3d4] sm:$0xf] }
  0x63   :  { %v2773_v24 = vld [vmem:[#allocation2 + $0x32c] sm:$0xf0] }
  0x64   :  { %1352 = vmatpush.bf16.msra.mxu2 %v2334_v45  ;;  %v2426_v45 = vor.u32 %v2804_v32, %v2425_v31  ;;  %v2562_v31 = vor.u32 %v2837_v26, %v2561_v25  ;;  %v2017_v32 = vld [vmem:[#allocation2 + $0xd0] sm:$0xf]  ;;  %v2409_v25 = vld [vmem:[#allocation2 + $0x3d8] sm:$0xf] }
  0x65   :  { %1327 = vmatpush.bf16.msra.mxu0 %v2554_v57  ;;  %v2402_v57 = vor.u32 %v2797_v46, %v2401_v44  ;;  %v2765_v36 = vld [vmem:[#allocation2 + $0x2ec] sm:$0xf0]  ;;  %v2798_v26 = vld [vmem:[#allocation2 + $0x3f4] sm:$0xf0] }
  0x66   :  { %1340 = vmatpush.bf16.msra.mxu1 %v2046_v58  ;;  %1369 = vmatpush.bf16.msra.mxu3 %v2462_v38  ;;  %v2658_v58 = vor.u32 %v2861_v48, %v2657_v47  ;;  %v2529_v37 = vld [vmem:[#allocation2 + $0x4d0] sm:$0xf]  ;;  %v2022_v47 = vor.u32 %v2697_v39, %v2019_v40  ;;  %v2790_v39 = vld [vmem:[#allocation2 + $0x3b4] sm:$0xf0] }
  0x67   :  { %v2829_v38 = vld [vmem:[#allocation2 + $0x4ec] sm:$0xf0] }
  0x68   :  { %1353 = vmatpush.bf16.msra.mxu2 %v2302_v60  ;;  %v2113_v60 = vld [vmem:[#allocation2 + $0x190] sm:$0xf]  ;;  %v2530_v43 = vor.u32 %v2829_v38, %v2529_v37  ;;  %v2726_v37 = vld [vmem:[#allocation2 + $0x1b4] sm:$0xf0] }
  0x69   :  { %1328 = vmatpush.bf16.msra.mxu0 %v2522_v6  ;;  %v2114_v5 = vor.u32 %v2725_v61, %v2113_v60  ;;  %v2370_v6 = vor.u32 %v2789_v0, %v2369_v62  ;;  %v1985_v44 = vld [vmem:[#allocation2 + $0x90] sm:$0xf]  ;;  %v1990_v62 = vor.u32 %v2689_v51, %v1987_v53  ;;  %v2377_v38 = vld [vmem:[#allocation2 + $0x398] sm:$0xf] }
  0x6a   :  { %1341 = vmatpush.bf16.msra.mxu1 %v2014_v7  ;;  %1370 = vmatpush.bf16.msra.mxu3 %v2430_v54  ;;  %v2626_v7 = vor.u32 %v2853_v2, %v2625_v1  ;;  %v2241_v46 = vld [vmem:[#allocation2 + $0x290] sm:$0xf]  ;;  %v2681_v2 = vld [vmem:[#allocation2 + $0x54] sm:$0xf]  ;;  %v2782_v51 = vld [vmem:[#allocation2 + $0x374] sm:$0xf0] }
  0x6b   :  { %v2757_v48 = vld [vmem:[#allocation2 + $0x2ac] sm:$0xf0] }
  0x6c   :  { %1354 = vmatpush.bf16.msra.mxu2 %v2270_v8  ;;  %v2081_v8 = vld [vmem:[#allocation2 + $0x150] sm:$0xf] }
  0x6d   :  { %1329 = vmatpush.bf16.msra.mxu0 %v2490_v18  ;;  %1371 = vmatmul.bf16.vlgmr.msra.gmra.mxu3 %v2982_v52  ;;  %v2082_v17 = vor.u32 %v2717_v9, %v2081_v8  ;;  %v2338_v18 = vor.u32 %v2781_v12, %v2337_v10  ;;  %v2685_v60 = vld [vmem:[#allocation2 + $0x6c] sm:$0xf0]  ;;  %v1958_v12 = vor.u32 %v2681_v2, %v1955_v3  ;;  %v2774_v2 = vld [vmem:[#allocation2 + $0x334] sm:$0xf0] }
  0x6e   :  { %1342 = vmatpush.bf16.msra.mxu1 %v1982_v19  ;;  %1415 = vmatpush.bf16.msrb.mxu3 %v2150_v63  ;;  %v2594_v19 = vor.u32 %v2845_v14, %v2593_v13  ;;  %v2209_v61 = vld [vmem:[#allocation2 + $0x250] sm:$0xf]  ;;  %v2673_v14 = vld [vmem:[#allocation2 + $0x14] sm:$0xf] }
  0x6f   :  { %v2749_v63 = vld [vmem:[#allocation2 + $0x26c] sm:$0xf0]  ;;  %v1926_v27 = vor.u32 %v2673_v14, %v1923_v15  ;;  %v2766_v14 = vld [vmem:[#allocation2 + $0x2f4] sm:$0xf0] }
  0x70   :  { %1355 = vmatpush.bf16.msra.mxu2 %v2238_v20  ;;  %v2049_v20 = vld [vmem:[#allocation2 + $0x110] sm:$0xf] }
  0x71   :  { %1330 = vmatpush.bf16.msra.mxu0 %v2458_v30  ;;  %v2050_v29 = vor.u32 %v2709_v21, %v2049_v20  ;;  %v2306_v30 = vor.u32 %v2773_v24, %v2305_v22  ;;  %v2465_v0 = vld [vmem:[#allocation2 + $0x450] sm:$0xf]  ;;  %v2659_v20 = vld [vmem:[#allocation2 + $0x5f0] sm:$0xf0]  ;;  %v2153_v21 = vld [vmem:[#allocation2 + $0x1d8] sm:$0xf] }
  0x72   :  { %1343 = vmatpush.bf16.msra.mxu1 %v1950_v33  ;;  %1416 = vmatpush.bf16.msrb.mxu3 %v2118_v11  ;;  %v2701_v33 = vld [vmem:[#allocation2 + $0xec] sm:$0xf0]  ;;  %v2734_v22 = vld [vmem:[#allocation2 + $0x1f4] sm:$0xf0] }
  0x73   :  { %v2018_v41 = vor.u32 %v2701_v33, %v2017_v32  ;;  %v2813_v1 = vld [vmem:[#allocation2 + $0x46c] sm:$0xf0]  ;;  %v2371_v32 = vld [vmem:[#allocation2 + $0x3b0] sm:$0xf0] }
  0x74   :  { %1356 = vmatpush.bf16.msra.mxu2 %v2206_v34  ;;  %v2273_v34 = vld [vmem:[#allocation2 + $0x2d0] sm:$0xf]  ;;  %v2466_v8 = vor.u32 %v2813_v1, %v2465_v0  ;;  %v2849_v33 = vld [vmem:[#allocation2 + $0x594] sm:$0xf]  ;;  %v2710_v0 = vld [vmem:[#allocation2 + $0x134] sm:$0xf0] }
  0x75   :  { %1331 = vmatpush.bf16.msra.mxu0 %v2426_v45  ;;  %v2274_v42 = vor.u32 %v2765_v36, %v2273_v34  ;;  %v2693_v45 = vld [vmem:[#allocation2 + $0xac] sm:$0xf0]  ;;  %v2410_v34 = vor.u32 %v2798_v26, %v2409_v25  ;;  %v2121_v36 = vld [vmem:[#allocation2 + $0x198] sm:$0xf] }
  0x76   :  { %1344 = vmatpush.bf16.msra.mxu1 %v1918_v49  ;;  %1417 = vmatpush.bf16.msrb.mxu3 %v2086_v23  ;;  %v2497_v49 = vld [vmem:[#allocation2 + $0x490] sm:$0xf]  ;;  %v1986_v54 = vor.u32 %v2693_v45, %v1985_v44  ;;  %v2339_v44 = vld [vmem:[#allocation2 + $0x370] sm:$0xf0]  ;;  %v2313_v1 = vld [vmem:[#allocation2 + $0x318] sm:$0xf] }
  0x77   :  { %v2177_v9 = vld [vmem:[#allocation2 + $0x210] sm:$0xf]  ;;  %v2841_v45 = vld [vmem:[#allocation2 + $0x554] sm:$0xf]  ;;  %v2249_v25 = vld [vmem:[#allocation2 + $0x298] sm:$0xf] }
  0x78   :  { %1357 = vmatpush.bf16.msra.mxu2 %v2174_v50  ;;  %1332 = vmatmul.bf16.vlgmr.msra.gmra.mxu0 %v2982_v52  ;;  %v2821_v50 = vld [vmem:[#allocation2 + $0x4ac] sm:$0xf0]  ;;  %v2758_v26 = vld [vmem:[#allocation2 + $0x2b4] sm:$0xf0] }
  0x79   :  { %1376 = vmatpush.bf16.msrb.mxu0 %v2146_v55  ;;  %1345 = vmatmul.bf16.vlgmr.msra.gmra.mxu1 %v2984_v56  ;;  %v2242_v55 = vor.u32 %v2757_v48, %v2241_v46  ;;  %v2741_v10 = vld [vmem:[#allocation2 + $0x22c] sm:$0xf0]  ;;  %v2378_v46 = vor.u32 %v2790_v39, %v2377_v38  ;;  %v2089_v48 = vld [vmem:[#allocation2 + $0x158] sm:$0xf] }
  0x7a   :  { %1389 = vmatpush.bf16.msrb.mxu1 %v2402_v57  ;;  %1418 = vmatpush.bf16.msrb.mxu3 %v2054_v35  ;;  %v2498_v57 = vor.u32 %v2821_v50, %v2497_v49  ;;  %v2433_v11 = vld [vmem:[#allocation2 + $0x410] sm:$0xf]  ;;  %v2178_v23 = vor.u32 %v2741_v10, %v2177_v9  ;;  %v2627_v35 = vld [vmem:[#allocation2 + $0x5b0] sm:$0xf0]  ;;  %v2718_v49 = vld [vmem:[#allocation2 + $0x174] sm:$0xf0]  ;;  %v2314_v9 = vor.u32 %v2774_v2, %v2313_v1 }
  0x7b   :  { %1358 = vmatmul.bf16.vlgmr.msra.gmra.mxu2 %v2986_v59  ;;  %v2805_v13 = vld [vmem:[#allocation2 + $0x42c] sm:$0xf0]  ;;  %v2345_v50 = vld [vmem:[#allocation2 + $0x358] sm:$0xf]  ;;  %v2531_v10 = vld [vmem:[#allocation2 + $0x4f0] sm:$0xf0] }
  0x7c   :  { %1402 = vmatpush.bf16.msrb.mxu2 %v2658_v58  ;;  %v1953_v58 = vld [vmem:[#allocation2 + $0x50] sm:$0xf]  ;;  %v2434_v24 = vor.u32 %v2805_v13, %v2433_v11  ;;  %v2025_v11 = vld [vmem:[#allocation2 + $0xd8] sm:$0xf] }
  0x7d   :  { %1377 = vmatpush.bf16.msrb.mxu0 %v2114_v5  ;;  %v1954_v4 = vor.u32 %v2685_v60, %v1953_v58  ;;  %v1921_v5 = vld [vmem:[#allocation2 + $0x10] sm:$0xf]  ;;  %v2307_v58 = vld [vmem:[#allocation2 + $0x330] sm:$0xf0]  ;;  %v2281_v13 = vld [vmem:[#allocation2 + $0x2d8] sm:$0xf] }
  0x7e   :  { %1390 = vmatpush.bf16.msrb.mxu1 %v2370_v6  ;;  %1419 = vmatpush.bf16.msrb.mxu3 %v2022_v47  ;;  %v2677_v6 = vld [vmem:[#allocation2 + $0x2c] sm:$0xf0]  ;;  %v2595_v47 = vld [vmem:[#allocation2 + $0x570] sm:$0xf0]  ;;  %v2750_v38 = vld [vmem:[#allocation2 + $0x274] sm:$0xf0] }
  0x7f   :  { %v2833_v60 = vld [vmem:[#allocation2 + $0x514] sm:$0xf] }
  0x80   :  { %1403 = vmatpush.bf16.msrb.mxu2 %v2626_v7  ;;  %v2210_v7 = vor.u32 %v2749_v63, %v2209_v61  ;;  %v2346_v61 = vor.u32 %v2782_v51, %v2345_v50  ;;  %v2057_v63 = vld [vmem:[#allocation2 + $0x118] sm:$0xf] }
  0x81   :  { %1378 = vmatpush.bf16.msrb.mxu0 %v2082_v17  ;;  %v2403_v17 = vld [vmem:[#allocation2 + $0x3f0] sm:$0xf0]  ;;  %v2742_v50 = vld [vmem:[#allocation2 + $0x234] sm:$0xf0] }
  0x82   :  { %1391 = vmatpush.bf16.msrb.mxu1 %v2338_v18  ;;  %1420 = vmatpush.bf16.msrb.mxu3 %v1990_v62  ;;  %v2857_v18 = vld [vmem:[#allocation2 + $0x5d4] sm:$0xf]  ;;  %v2406_v28 = vor.u32 %v2793_v16, %v2403_v17  ;;  %v2665_v51 = vld [vmem:[#allocation2 + $0x5d8] sm:$0xf] }
  0x83   :  { %v2563_v62 = vld [vmem:[#allocation2 + $0x530] sm:$0xf0] }
  0x84   :  { %1404 = vmatpush.bf16.msrb.mxu2 %v2594_v19  ;;  %v1922_v19 = vor.u32 %v2677_v6, %v1921_v5  ;;  %v2058_v5 = vor.u32 %v2710_v0, %v2057_v63  ;;  %v2761_v6 = vld [vmem:[#allocation2 + $0x2d4] sm:$0xf]  ;;  %v2858_v63 = vld [vmem:[#allocation2 + $0x5dc] sm:$0xf] }
  0x85   :  { %1379 = vmatpush.bf16.msrb.mxu0 %v2050_v29  ;;  %v2662_v29 = vor.u32 %v2857_v18, %v2659_v20  ;;  %v2753_v18 = vld [vmem:[#allocation2 + $0x294] sm:$0xf]  ;;  %v2667_v0 = vld [vmem:[#allocation2 + $0x5f8] sm:$0xf0] }
  0x86   :  { %1392 = vmatpush.bf16.msrb.mxu1 %v2306_v30  ;;  %1421 = vmatpush.bf16.msrb.mxu3 %v1958_v12  ;;  %v2154_v30 = vor.u32 %v2734_v22, %v2153_v21  ;;  %v2702_v12 = vld [vmem:[#allocation2 + $0xf4] sm:$0xf0]  ;;  %v2817_v20 = vld [vmem:[#allocation2 + $0x494] sm:$0xf]  ;;  %v2282_v21 = vor.u32 %v2766_v14, %v2281_v13  ;;  %v2635_v13 = vld [vmem:[#allocation2 + $0x5b8] sm:$0xf0] }
  0x87   :  { %v2026_v17 = vor.u32 %v2702_v12, %v2025_v11  ;;  %v2499_v22 = vld [vmem:[#allocation2 + $0x4b0] sm:$0xf0]  ;;  %v2379_v11 = vld [vmem:[#allocation2 + $0x3b8] sm:$0xf0] }
  0x88   :  { %1405 = vmatpush.bf16.msrb.mxu2 %v2562_v31  ;;  %v2785_v31 = vld [vmem:[#allocation2 + $0x394] sm:$0xf]  ;;  %v2850_v12 = vld [vmem:[#allocation2 + $0x59c] sm:$0xf] }
  0x89   :  { %1380 = vmatpush.bf16.msrb.mxu0 %v2018_v41  ;;  %v2374_v40 = vor.u32 %v2785_v31, %v2371_v32  ;;  %v2630_v41 = vor.u32 %v2849_v33, %v2627_v35  ;;  %v2211_v31 = vld [vmem:[#allocation2 + $0x270] sm:$0xf0]  ;;  %v2250_v33 = vor.u32 %v2758_v26, %v2249_v25  ;;  %v1961_v35 = vld [vmem:[#allocation2 + $0x58] sm:$0xf]  ;;  %v2842_v25 = vld [vmem:[#allocation2 + $0x55c] sm:$0xf] }
  0x8a   :  { %1393 = vmatpush.bf16.msrb.mxu1 %v2274_v42  ;;  %1422 = vmatpush.bf16.msrb.mxu3 %v1926_v27  ;;  %v2122_v42 = vor.u32 %v2726_v37, %v2121_v36  ;;  %v2809_v32 = vld [vmem:[#allocation2 + $0x454] sm:$0xf]  ;;  %v2686_v36 = vld [vmem:[#allocation2 + $0x74] sm:$0xf0]  ;;  %v2603_v26 = vld [vmem:[#allocation2 + $0x578] sm:$0xf0] }
  0x8b   :  { %v2217_v37 = vld [vmem:[#allocation2 + $0x258] sm:$0xf] }
  0x8c   :  { %1406 = vmatpush.bf16.msrb.mxu2 %v2530_v43  ;;  %v2777_v43 = vld [vmem:[#allocation2 + $0x354] sm:$0xf] }
  0x8d   :  { %1381 = vmatpush.bf16.msrb.mxu0 %v1986_v54  ;;  %v2342_v53 = vor.u32 %v2777_v43, %v2339_v44  ;;  %1423 = vmatmul.bf16.vlgmr.msrb.gmra.mxu3 %v2984_v56  ;;  %v2598_v54 = vor.u32 %v2841_v45, %v2595_v47  ;;  %v1962_v43 = vor.u32 %v2686_v36, %v1961_v35  ;;  %v2801_v44 = vld [vmem:[#allocation2 + $0x414] sm:$0xf]  ;;  %v2059_v35 = vld [vmem:[#allocation2 + $0x138] sm:$0xf0] }
  0x8e   :  { %1394 = vmatpush.bf16.msrb.mxu1 %v2242_v55  ;;  %1467 = vmatpush.bf16.msra.mxu3 %v2410_v34  ;;  %v2090_v55 = vor.u32 %v2718_v49, %v2089_v48  ;;  %v2467_v34 = vld [vmem:[#allocation2 + $0x470] sm:$0xf0]  ;;  %v2218_v47 = vor.u32 %v2750_v38, %v2217_v37  ;;  %v2678_v48 = vld [vmem:[#allocation2 + $0x34] sm:$0xf0]  ;;  %v2770_v36 = vld [vmem:[#allocation2 + $0x31c] sm:$0xf] }
  0x8f   :  { %v2435_v45 = vld [vmem:[#allocation2 + $0x430] sm:$0xf0]  ;;  %v2185_v49 = vld [vmem:[#allocation2 + $0x218] sm:$0xf]  ;;  %v2315_v37 = vld [vmem:[#allocation2 + $0x338] sm:$0xf0] }
  0x90   :  { %1407 = vmatpush.bf16.msrb.mxu2 %v2498_v57  ;;  %v2769_v57 = vld [vmem:[#allocation2 + $0x314] sm:$0xf]  ;;  %v2186_v1 = vor.u32 %v2742_v50, %v2185_v49  ;;  %v2834_v38 = vld [vmem:[#allocation2 + $0x51c] sm:$0xf] }
  0x91   :  { %1382 = vmatpush.bf16.msrb.mxu0 %v1954_v4  ;;  %v2310_v3 = vor.u32 %v2769_v57, %v2307_v58  ;;  %v2566_v4 = vor.u32 %v2833_v60, %v2563_v62  ;;  %v2155_v57 = vld [vmem:[#allocation2 + $0x1f8] sm:$0xf0] }
  0x92   :  { %1395 = vmatpush.bf16.msrb.mxu1 %v2210_v7  ;;  %1468 = vmatpush.bf16.msra.mxu3 %v2378_v46  ;;  %v2275_v7 = vld [vmem:[#allocation2 + $0x2f0] sm:$0xf0]  ;;  %v1929_v46 = vld [vmem:[#allocation2 + $0x18] sm:$0xf]  ;;  %v2794_v58 = vld [vmem:[#allocation2 + $0x3dc] sm:$0xf] }
  0x93   :  { %v2278_v15 = vor.u32 %v2761_v6, %v2275_v7  ;;  %v2411_v60 = vld [vmem:[#allocation2 + $0x3f8] sm:$0xf0]  ;;  %v1930_v62 = vor.u32 %v2678_v48, %v1929_v46  ;;  %v2854_v6 = vld [vmem:[#allocation2 + $0x5b4] sm:$0xf0] }
  0x94   :  { %1408 = vmatpush.bf16.msrb.mxu2 %v2466_v8  ;;  %v2825_v8 = vld [vmem:[#allocation2 + $0x4d4] sm:$0xf]  ;;  %v2722_v7 = vld [vmem:[#allocation2 + $0x19c] sm:$0xf]  ;;  %v2537_v46 = vld [vmem:[#allocation2 + $0x4d8] sm:$0xf] }
  0x95   :  { %1383 = vmatpush.bf16.msrb.mxu0 %v1922_v19  ;;  %v2534_v16 = vor.u32 %v2825_v8, %v2531_v10  ;;  %v2243_v19 = vld [vmem:[#allocation2 + $0x2b0] sm:$0xf0]  ;;  %v2670_v8 = vor.u32 %v2858_v63, %v2667_v0  ;;  %v2786_v10 = vld [vmem:[#allocation2 + $0x39c] sm:$0xf]  ;;  %v2505_v63 = vld [vmem:[#allocation2 + $0x498] sm:$0xf] }
  0x96   :  { %1396 = vmatpush.bf16.msrb.mxu1 %v2178_v23  ;;  %1469 = vmatpush.bf16.msra.mxu3 %v2346_v61  ;;  %v1993_v23 = vld [vmem:[#allocation2 + $0x98] sm:$0xf]  ;;  %v2246_v27 = vor.u32 %v2753_v18, %v2243_v19  ;;  %v2438_v61 = vor.u32 %v2801_v44, %v2435_v45  ;;  %v2714_v19 = vld [vmem:[#allocation2 + $0x15c] sm:$0xf]  ;;  %v2318_v44 = vor.u32 %v2770_v36, %v2315_v37 }
  0x97   :  { %v2846_v18 = vld [vmem:[#allocation2 + $0x574] sm:$0xf0]  ;;  %v2698_v48 = vld [vmem:[#allocation2 + $0xdc] sm:$0xf] }
  0x98   :  { %1409 = vmatpush.bf16.msrb.mxu2 %v2434_v24  ;;  %1384 = vmatmul.bf16.vlgmr.msrb.gmra.mxu0 %v2984_v56  ;;  %v2694_v24 = vld [vmem:[#allocation2 + $0xb4] sm:$0xf0]  ;;  %v2027_v50 = vld [vmem:[#allocation2 + $0xf8] sm:$0xf0] }
  0x99   :  { %1428 = vmatpush.bf16.msra.mxu0 %v2406_v28  ;;  %1397 = vmatmul.bf16.vlgmr.msrb.gmra.mxu1 %v2986_v59  ;;  %v2502_v28 = vor.u32 %v2817_v20, %v2499_v22  ;;  %v2091_v20 = vld [vmem:[#allocation2 + $0x178] sm:$0xf0]  ;;  %v2822_v0 = vld [vmem:[#allocation2 + $0x4b4] sm:$0xf0] }
  0x9a   :  { %1441 = vmatpush.bf16.msra.mxu1 %v2662_v29  ;;  %1470 = vmatpush.bf16.msra.mxu3 %v2314_v9  ;;  %v1994_v29 = vor.u32 %v2694_v24, %v1993_v23  ;;  %v2123_v9 = vld [vmem:[#allocation2 + $0x1b8] sm:$0xf0]  ;;  %v3008_v24 = vld [vmem:[%s3275_s2] sm:$0xff] }
  0x9b   :  { %1410 = vmatmul.bf16.vlgmr.msrb.gmra.mxu2 %v2982_v52  ;;  %v2778_v22 = vld [vmem:[#allocation2 + $0x35c] sm:$0xf] }
  0x9c   :  { %1454 = vmatpush.bf16.msra.mxu2 %v2154_v30  ;;  %v2745_v30 = vld [vmem:[#allocation2 + $0x254] sm:$0xf]  ;;  %v2347_v23 = vld [vmem:[#allocation2 + $0x378] sm:$0xf0] }
  0x9d   :  { %1429 = vmatpush.bf16.msra.mxu0 %v2374_v40  ;;  %v2214_v39 = vor.u32 %v2745_v30, %v2211_v31  ;;  %v2737_v40 = vld [vmem:[#allocation2 + $0x214] sm:$0xf]  ;;  %v2350_v30 = vor.u32 %v2778_v22, %v2347_v23  ;;  %v2838_v31 = vld [vmem:[#allocation2 + $0x534] sm:$0xf0]  ;;  %v2810_v22 = vld [vmem:[#allocation2 + $0x45c] sm:$0xf] }
  0x9e   :  { %1442 = vmatpush.bf16.msra.mxu1 %v2630_v41  ;;  %1471 = vmatpush.bf16.msra.mxu3 %v2282_v21  ;;  %v2179_v41 = vld [vmem:[#allocation2 + $0x230] sm:$0xf0]  ;;  %v2638_v21 = vor.u32 %v2850_v12, %v2635_v13  ;;  %v2475_v23 = vld [vmem:[#allocation2 + $0x478] sm:$0xf0] }
  0x9f   :  { %v2802_v36 = vld [vmem:[#allocation2 + $0x41c] sm:$0xf] }
  0xa0   :  { %1455 = vmatpush.bf16.msra.mxu2 %v2122_v42  ;;  %v2470_v42 = vor.u32 %v2809_v32, %v2467_v34  ;;  %v2706_v32 = vld [vmem:[#allocation2 + $0x11c] sm:$0xf]  ;;  %v2606_v34 = vor.u32 %v2842_v25, %v2603_v26 }
  0xa1   :  { %1430 = vmatpush.bf16.msra.mxu0 %v2342_v53  ;;  %v2862_v53 = vld [vmem:[#allocation2 + $0x5f4] sm:$0xf0]  ;;  %v2443_v37 = vld [vmem:[#allocation2 + $0x438] sm:$0xf0] }
  0xa2   :  { %1443 = vmatpush.bf16.msra.mxu1 %v2598_v54  ;;  %1472 = vmatpush.bf16.msra.mxu3 %v2250_v33  ;;  %v2730_v54 = vld [vmem:[#allocation2 + $0x1dc] sm:$0xf]  ;;  %v2666_v2 = vor.u32 %v2862_v53, %v2665_v51  ;;  %v233_v33 = vperm.slane %v3008_v24, 0 }
  0xa3   :  { %v2762_v51 = vld [vmem:[#allocation2 + $0x2dc] sm:$0xf] }
  0xa4   :  { %1456 = vmatpush.bf16.msra.mxu2 %v2090_v55  ;;  %v2182_v55 = vor.u32 %v2737_v40, %v2179_v41  ;;  %v2283_v53 = vld [vmem:[#allocation2 + $0x2f8] sm:$0xf0] }
  0xa5   :  { %1431 = vmatpush.bf16.msra.mxu0 %v2310_v3  ;;  %v2158_v3 = vor.u32 %v2730_v54, %v2155_v57  ;;  %v2539_v57 = vld [vmem:[#allocation2 + $0x4f8] sm:$0xf0] }
  0xa6   :  { %1444 = vmatpush.bf16.msra.mxu1 %v2566_v4  ;;  %1473 = vmatpush.bf16.msra.mxu3 %v2218_v47  ;;  %v2414_v4 = vor.u32 %v2794_v58, %v2411_v60  ;;  %v2830_v47 = vld [vmem:[#allocation2 + $0x4f4] sm:$0xf0]  ;;  %v2030_v60 = vor.u32 %v2698_v48, %v2027_v50 }
  0xa7   :  { %v2538_v58 = vor.u32 %v2830_v47, %v2537_v46 }
  0xa8   :  { %1457 = vmatpush.bf16.msra.mxu2 %v2058_v5  ;;  %v2633_v5 = vld [vmem:[#allocation2 + $0x598] sm:$0xf] }
  0xa9   :  { %1432 = vmatpush.bf16.msra.mxu0 %v2278_v15  ;;  %v2634_v14 = vor.u32 %v2854_v6, %v2633_v5  ;;  %v2601_v15 = vld [vmem:[#allocation2 + $0x558] sm:$0xf]  ;;  %v2754_v5 = vld [vmem:[#allocation2 + $0x29c] sm:$0xf] }
  0xaa   :  { %1445 = vmatpush.bf16.msra.mxu1 %v2534_v16  ;;  %1474 = vmatpush.bf16.msra.mxu3 %v2186_v1  ;;  %v2126_v16 = vor.u32 %v2722_v7, %v2123_v9  ;;  %v2690_v1 = vld [vmem:[#allocation2 + $0x9c] sm:$0xf] }
  0xab   :  { %v2251_v6 = vld [vmem:[#allocation2 + $0x2b8] sm:$0xf0] }
  0xac   :  { %1458 = vmatpush.bf16.msra.mxu2 %v2026_v17  ;;  %v2382_v17 = vor.u32 %v2786_v10, %v2379_v11  ;;  %v2818_v7 = vld [vmem:[#allocation2 + $0x49c] sm:$0xf]  ;;  %v2506_v10 = vor.u32 %v2822_v0, %v2505_v63 }
  0xad   :  { %1433 = vmatpush.bf16.msra.mxu0 %v2246_v27  ;;  %v2602_v27 = vor.u32 %v2846_v18, %v2601_v15  ;;  %1475 = vmatmul.bf16.vlgmr.msra.gmra.mxu3 %v2986_v59  ;;  %v2473_v15 = vld [vmem:[#allocation2 + $0x458] sm:$0xf] }
  0xae   :  { %1446 = vmatpush.bf16.msra.mxu1 %v2502_v28  ;;  %1519 = vmatpush.bf16.msrb.mxu3 %v2670_v8  ;;  %v2569_v28 = vld [vmem:[#allocation2 + $0x518] sm:$0xf]  ;;  %v2507_v8 = vld [vmem:[#allocation2 + $0x4b8] sm:$0xf0] }
  0xaf   :  { %v2570_v40 = vor.u32 %v2838_v31, %v2569_v28  ;;  %v2510_v18 = vor.u32 %v2818_v7, %v2507_v8  ;;  %v2441_v28 = vld [vmem:[#allocation2 + $0x418] sm:$0xf]  ;;  %v237_v8 = vperm.slane %v3008_v24, 4 }
  0xb0   :  { %1459 = vmatpush.bf16.msra.mxu2 %v1994_v29  ;;  %v2094_v29 = vor.u32 %v2714_v19, %v2091_v20  ;;  %v1963_v19 = vld [vmem:[#allocation2 + $0x78] sm:$0xf0] }
  0xb1   :  { %1434 = vmatpush.bf16.msra.mxu0 %v2214_v39  ;;  %v2571_v39 = vld [vmem:[#allocation2 + $0x538] sm:$0xf0] }
  0xb2   :  { %1447 = vmatpush.bf16.msra.mxu1 %v2470_v42  ;;  %1520 = vmatpush.bf16.msrb.mxu3 %v2638_v21  ;;  %v2574_v49 = vor.u32 %v2834_v38, %v2571_v39  ;;  %v2746_v20 = vld [vmem:[#allocation2 + $0x25c] sm:$0xf] }
  0xb3   :  { %v2219_v21 = vld [vmem:[#allocation2 + $0x278] sm:$0xf0] }
  0xb4   :  { %1460 = vmatpush.bf16.msra.mxu2 %v1962_v43  ;;  %v2062_v43 = vor.u32 %v2706_v32, %v2059_v35  ;;  %v2478_v32 = vor.u32 %v2810_v22, %v2475_v23  ;;  %v2187_v35 = vld [vmem:[#allocation2 + $0x238] sm:$0xf0]  ;;  %v2941_v22 = vmov 8.0  }
  0xb5   :  { %1435 = vmatpush.bf16.msra.mxu0 %v2182_v55  ;;  %v2826_v55 = vld [vmem:[#allocation2 + $0x4dc] sm:$0xf]  ;;  %2868 = vrcp.f32 %v2941_v22 }
  0xb6   :  { %1448 = vmatpush.bf16.msra.mxu1 %v2438_v61  ;;  %1521 = vmatpush.bf16.msrb.mxu3 %v2606_v34  ;;  %v2286_v61 = vor.u32 %v2762_v51, %v2283_v53  ;;  %v2738_v34 = vld [vmem:[#allocation2 + $0x21c] sm:$0xf] }
  0xb8   :  { %1461 = vmatpush.bf16.msra.mxu2 %v1930_v62  ;;  %1436 = vmatmul.bf16.vlgmr.msra.gmra.mxu0 %v2986_v59  ;;  %v1229_v41 = vpop.f32.mrf.mxu0 }
  0xb9   :  { %1480 = vmatpush.bf16.msrb.mxu0 %v2666_v2  ;;  %1449 = vmatmul.bf16.vlgmr.msra.gmra.mxu1 %v2982_v52  ;;  %v1242_v42 = vpop.f32.mrf.mxu1  ;;  %v1230_v45 = vadd.f32 %v1229_v41, %v233_v33  ;;  %v2542_v2 = vor.u32 %v2826_v55, %v2539_v57  ;;  %v1931_v33 = vld [vmem:[#allocation2 + $0x38] sm:$0xf0]  ;;  %v2190_v41 = vor.u32 %v2738_v34, %v2187_v35 }
  0xba   :  { %1493 = vmatpush.bf16.msrb.mxu1 %v2158_v3  ;;  %1522 = vmatpush.bf16.msrb.mxu3 %v2574_v49  ;;  %v235_v49 = vperm.slane %v3008_v24, 2 }
  0xbb   :  { %1462 = vmatmul.bf16.vlgmr.msra.gmra.mxu2 %v2984_v56  ;;  %v1243_v54 = vadd.f32 %v1242_v42, %v1230_v45  ;;  %v2446_v42 = vor.u32 %v2802_v36, %v2443_v37 }
  0xbc   :  { %1506 = vmatpush.bf16.msrb.mxu2 %v2414_v4  ;;  %v1995_v4 = vld [vmem:[#allocation2 + $0xb8] sm:$0xf0] }
  0xbd   :  { %1481 = vmatpush.bf16.msrb.mxu0 %v2634_v14  ;;  %v1998_v13 = vor.u32 %v2690_v1, %v1995_v4  ;;  %v2254_v14 = vor.u32 %v2754_v5, %v2251_v6 }
  0xbe   :  { %1494 = vmatpush.bf16.msrb.mxu1 %v2126_v16  ;;  %v1255_v62 = vpop.f32.mrf.mxu2  ;;  %v2814_v16 = vld [vmem:[#allocation2 + $0x474] sm:$0xf0]  ;;  %1523 = vmatpush.bf16.msrb.mxu3 %v2542_v2 }
  0xbf   :  { %v3014_v3 = vadd.f32 %v1255_v62, %v1243_v54  ;;  %v2474_v25 = vor.u32 %v2814_v16, %v2473_v15 }
  0xc0   :  { %1507 = vmatpush.bf16.msrb.mxu2 %v2382_v17  ;;  %v1268_v9 = vpop.f32.mrf.mxu3  ;;  %v1231_v11 = vpop.f32.mrf.mxu0  ;;  %v2682_v17 = vld [vmem:[#allocation2 + $0x5c] sm:$0xf] }
  0xc1   :  { %1482 = vmatpush.bf16.msrb.mxu0 %v2602_v27  ;;  %v1244_v12 = vpop.f32.mrf.mxu1  ;;  %v1966_v26 = vor.u32 %v2682_v17, %v1963_v19  ;;  %v2222_v27 = vor.u32 %v2746_v20, %v2219_v21 }
  0xc2   :  { %1495 = vmatpush.bf16.msrb.mxu1 %v2094_v29  ;;  %v2806_v29 = vld [vmem:[#allocation2 + $0x434] sm:$0xf0]  ;;  %1524 = vmatpush.bf16.msrb.mxu3 %v2510_v18 }
  0xc3   :  { %v2442_v39 = vor.u32 %v2806_v29, %v2441_v28  ;;  %v3035_v28 = vmax.f32 %v3014_v3, 0.0 }
  0xc4   :  { %1508 = vmatpush.bf16.msrb.mxu2 %v2350_v30  ;;  %v2674_v30 = vld [vmem:[#allocation2 + $0x1c] sm:$0xf] }
  0xc5   :  { %1483 = vmatpush.bf16.msrb.mxu0 %v2570_v40  ;;  %v1934_v40 = vor.u32 %v2674_v30, %v1931_v33  ;;  %v2869_v30 = vpop.eup %2868  ;;  %v1540_v35 = vrot.slane %v3035_v28, 4 }
  0xc6   :  { %1496 = vmatpush.bf16.msrb.mxu1 %v2062_v43  ;;  %v1257_v31 = vpop.f32.mrf.mxu2  ;;  %1525 = vmatpush.bf16.msrb.mxu3 %v2478_v32  ;;  %v234_v43 = vperm.slane %v3008_v24, 1  ;;  %v238_v32 = vperm.slane %v3008_v24, 5  ;;  %v1589_v36 = vmul.f32 8.0, %v2869_v30  ;;  %vm1593_vm0 = vweird.f32 %v2869_v30 }
  0xc8   :  { %1509 = vmatpush.bf16.msrb.mxu2 %v2318_v44  ;;  %v1270_v38 = vpop.f32.mrf.mxu3  ;;  %v1269_v44 = vadd.f32 %v1268_v9, %v234_v43 }
  0xc9   :  { %1484 = vmatpush.bf16.msrb.mxu0 %v2538_v58 }
  0xca   :  { %1497 = vmatpush.bf16.msrb.mxu1 %v2030_v60  ;;  %1526 = vmatpush.bf16.msrb.mxu3 %v2446_v42  ;;  %v1590_v42 = vsub.f32 1.0, %v1589_v36 }
  0xcc   :  { %1510 = vmatpush.bf16.msrb.mxu2 %v2286_v61 }
  0xcd   :  { %1485 = vmatpush.bf16.msrb.mxu0 %v2506_v10  ;;  %1527 = vmatmul.bf16.vlgmr.msrb.gmra.mxu3 %v2982_v52 }
  0xce   :  { %1498 = vmatpush.bf16.msrb.mxu1 %v1998_v13 }
  0xd0   :  { %1511 = vmatpush.bf16.msrb.mxu2 %v2254_v14  ;;  %v1320_v54 = vpop.f32.mrf.mxu3 }
  0xd1   :  { %1486 = vmatpush.bf16.msrb.mxu0 %v2474_v25 }
  0xd2   :  { %1499 = vmatpush.bf16.msrb.mxu1 %v1966_v26 }
  0xd4   :  { %1512 = vmatpush.bf16.msrb.mxu2 %v2222_v27 }
  0xd5   :  { %1487 = vmatpush.bf16.msrb.mxu0 %v2442_v39  ;;  %v1281_v45 = vpop.f32.mrf.mxu0 }
  0xd6   :  { %1500 = vmatpush.bf16.msrb.mxu1 %v1934_v40  ;;  %v1282_v46 = vadd.f32 %v1281_v45, %v1269_v44  ;;  %v1294_v47 = vpop.f32.mrf.mxu1 }
  0xd8   :  { %1513 = vmatpush.bf16.msrb.mxu2 %v2190_v41  ;;  %1488 = vmatmul.bf16.vlgmr.msrb.gmra.mxu0 %v2982_v52  ;;  %v1295_v48 = vadd.f32 %v1294_v47, %v1282_v46  ;;  %v1322_v60 = vpop.f32.mrf.mxu3  ;;  %v1541_v41 = vadd.f32 %v1540_v35, %v3035_v28 }
  0xd9   :  { %1501 = vmatmul.bf16.vlgmr.msrb.gmra.mxu1 %v2984_v56 }
  0xda   :  { %v3028_v23 = vmax.f32 %v1295_v48, 0.0 }
  0xdb   :  { %1514 = vmatmul.bf16.vlgmr.msrb.gmra.mxu2 %v2986_v59  ;;  %v236_v59 = vperm.slane %v3008_v24, 3 }
  0xdc   :  { %v1546_v29 = vrot.slane %v3028_v23, 4 }
  0xdd   :  { %v1283_v53 = vpop.f32.mrf.mxu0 }
  0xde   :  { %v1307_v50 = vpop.f32.mrf.mxu2  ;;  %v1296_v55 = vpop.f32.mrf.mxu1  ;;  %v1547_v37 = vadd.f32 %v1546_v29, %v3028_v23  ;;  %v1591_v53 = vmul.f32 %v2869_v30, %v1590_v42 }
  0xdf   :  { %v1308_v51 = vadd.f32 %v1307_v50, %v235_v49  ;;  %v1542_v50 = vrot.slane %v1541_v41, 2 }
  0xe0   :  { %v1548_v43 = vrot.slane %v1547_v37, 2 }
  0xe1   :  { %v1321_v57 = vadd.f32 %v1320_v54, %v1308_v51 }
  0xe2   :  { %v1549_v54 = vadd.f32 %v1548_v43, %v1547_v37 }
  0xe6   :  { %v1309_v58 = vpop.f32.mrf.mxu2 }
  0xf0   :  { %v1372_v0 = vpop.f32.mrf.mxu3 }
  0xf5   :  { %v1333_v56 = vpop.f32.mrf.mxu0 }
  0xf6   :  { %v1334_v61 = vadd.f32 %v1333_v56, %v1321_v57  ;;  %v1346_v52 = vpop.f32.mrf.mxu1  ;;  %v1543_v56 = vadd.f32 %v1542_v50, %v1541_v41  ;;  %v240_v50 = vperm.slane %v3008_v24, 7 }
  0xf7   :  { %v1347_v62 = vadd.f32 %v1346_v52, %v236_v59  ;;  %v1592_v52 = vadd.f32 %v2869_v30, %v1591_v53 }
  0xf8   :  { %v1374_v7 = vpop.f32.mrf.mxu3  ;;  %v3026_v19 = vmax.f32 %v1334_v61, 0.0 }
  0xf9   :  { %v1544_v7 = vrot.slane %v1543_v56, 1 }
  0xfa   :  { %v1552_v26 = vrot.slane %v3026_v19, 4 }
  0xfc   :  { %v1553_v33 = vadd.f32 %v1552_v26, %v3026_v19 }
  0xfd   :  { %v1335_v2 = vpop.f32.mrf.mxu0 }
  0xfe   :  { %v1359_v63 = vpop.f32.mrf.mxu2  ;;  %v1348_v5 = vpop.f32.mrf.mxu1  ;;  %v1554_v3 = vrot.slane %v1553_v33, 2 }
  0xff   :  { %v1360_v1 = vadd.f32 %v1359_v63, %v1347_v62  ;;  %v1550_v62 = vrot.slane %v1549_v54, 1 }
 0x100   :  { %v1555_v48 = vadd.f32 %v1554_v3, %v1553_v33  ;;  %v239_v33 = vperm.slane %v3008_v24, 6 }
 0x101   :  { %v1373_v4 = vadd.f32 %v1372_v0, %v1360_v1 }
 0x102   :  { %v1556_v58 = vrot.slane %v1555_v48, 1 }
 0x103   :  { %v3024_v18 = vmax.f32 %v1373_v4, 0.0 }
 0x104   :  { %v1557_v5 = vadd.f32 %v1556_v58, %v1555_v48 }
 0x105   :  { %v1558_v25 = vrot.slane %v3024_v18, 4 }
 0x106   :  { %v1361_v6 = vpop.f32.mrf.mxu2 }
 0x107   :  { %v1559_v31 = vadd.f32 %v1558_v25, %v3024_v18 }
 0x109   :  { %v1560_v38 = vrot.slane %v1559_v31, 2 }
 0x10b   :  { %v1561_v45 = vadd.f32 %v1560_v38, %v1559_v31 }
 0x10d   :  { %v1562_v55 = vrot.slane %v1561_v45, 1 }
 0x10f   :  { %v1563_v1 = vadd.f32 %v1562_v55, %v1561_v45 }
 0x110   :  { %v1424_v14 = vpop.f32.mrf.mxu3 }
 0x111   :  { %v1425_v39 = vadd.f32 %v1424_v14, %v238_v32 }
 0x115   :  { %v1385_v9 = vpop.f32.mrf.mxu0 }
 0x116   :  { %v1398_v10 = vpop.f32.mrf.mxu1  ;;  %v1386_v11 = vadd.f32 %v1385_v9, %v237_v8  ;;  %v3050_v9 = vsel %vm1593_vm0, %v2869_v30, %v1592_v52 }
 0x118   :  { %v1399_v12 = vadd.f32 %v1398_v10, %v1386_v11  ;;  %v1426_v21 = vpop.f32.mrf.mxu3  ;;  %v1551_v10 = vadd.f32 %v1550_v62, %v1549_v54  ;;  %v3053_v11 = vmul.f32 %v3050_v9, %v1563_v1 }
 0x11a   :  { %v1606_v22 = vsub.f32 %v3024_v18, %v3053_v11 }
 0x11d   :  { %v1387_v15 = vpop.f32.mrf.mxu0 }
 0x11e   :  { %v1411_v13 = vpop.f32.mrf.mxu2  ;;  %v1400_v16 = vpop.f32.mrf.mxu1  ;;  %v1545_v15 = vadd.f32 %v1544_v7, %v1543_v56 }
 0x11f   :  { %v1412_v20 = vadd.f32 %v1411_v13, %v1399_v12  ;;  %v3056_v13 = vmul.f32 %v3050_v9, %v1557_v5 }
 0x120   :  { %v3069_v30 = vmul.f32 %v3050_v9, %v1545_v15 }
 0x121   :  { %v3032_v27 = vmax.f32 %v1412_v20, 0.0  ;;  %v3059_v20 = vmul.f32 %v3050_v9, %v1551_v10  ;;  %v1605_v26 = vsub.f32 %v3026_v19, %v3056_v13 }
 0x122   :  { %v1603_v38 = vsub.f32 %v3035_v28, %v3069_v30 }
 0x123   :  { %v1564_v34 = vrot.slane %v3032_v27, 4  ;;  %v1604_v32 = vsub.f32 %v3028_v23, %v3059_v20  ;;  %v1613_v36 = vmul.f32 %v1605_v26, %v1605_v26 }
 0x125   :  { %v1565_v40 = vadd.f32 %v1564_v34, %v3032_v27  ;;  %v1614_v34 = vmul.f32 %v1606_v22, %v1606_v22  ;;  %v1631_v42 = vrot.slane %v1613_v36, 4 }
 0x126   :  { %v1413_v17 = vpop.f32.mrf.mxu2 }
 0x127   :  { %v1566_v49 = vrot.slane %v1565_v40, 2 }
 0x129   :  { %v1567_v60 = vadd.f32 %v1566_v49, %v1565_v40  ;;  %v1637_v40 = vrot.slane %v1614_v34, 4 }
 0x12b   :  { %v1568_v6 = vrot.slane %v1567_v60, 1 }
 0x12d   :  { %v1569_v14 = vadd.f32 %v1568_v6, %v1567_v60 }
 0x12f   :  { %v3066_v29 = vmul.f32 %v3050_v9, %v1569_v14 }
 0x130   :  { %v1476_v63 = vpop.f32.mrf.mxu3 }
 0x131   :  { %v1607_v37 = vsub.f32 %v3032_v27, %v3066_v29 }
 0x133   :  { %v1615_v43 = vmul.f32 %v1607_v37, %v1607_v37 }
 0x135   :  { %v1437_v44 = vpop.f32.mrf.mxu0  ;;  %v1643_v53 = vrot.slane %v1615_v43, 4 }
 0x136   :  { %v1438_v46 = vadd.f32 %v1437_v44, %v1425_v39  ;;  %v1450_v47 = vpop.f32.mrf.mxu1  ;;  %v1612_v39 = vmul.f32 %v1604_v32, %v1604_v32  ;;  %v1611_v44 = vmul.f32 %v1603_v38, %v1603_v38 }
 0x138   :  { %v1451_v51 = vadd.f32 %v1450_v47, %v1438_v46  ;;  %v1478_v21 = vpop.f32.mrf.mxu3  ;;  %v1625_v45 = vrot.slane %v1612_v39, 4  ;;  %v1638_v47 = vadd.f32 %v1637_v40, %v1614_v34  ;;  %v1619_v58 = vrot.slane %v1611_v44, 4 }
 0x13a   :  { %v3046_v57 = vmax.f32 %v1451_v51, 0.0  ;;  %v1632_v51 = vadd.f32 %v1631_v42, %v1613_v36  ;;  %v1626_v60 = vadd.f32 %v1625_v45, %v1612_v39  ;;  %v1620_v1 = vadd.f32 %v1619_v58, %v1611_v44 }
 0x13c   :  { %v1570_v59 = vrot.slane %v3046_v57, 4  ;;  %v1633_v62 = vrot.slane %v1632_v51, 2 }
 0x13d   :  { %v1439_v0 = vpop.f32.mrf.mxu0 }
 0x13e   :  { %v1463_v61 = vpop.f32.mrf.mxu2  ;;  %v1571_v2 = vadd.f32 %v1570_v59, %v3046_v57  ;;  %v1452_v4 = vpop.f32.mrf.mxu1  ;;  %v1639_v59 = vrot.slane %v1638_v47, 2  ;;  %v1644_v0 = vadd.f32 %v1643_v53, %v1615_v43 }
 0x13f   :  { %v1464_v3 = vadd.f32 %v1463_v61, %v239_v33 }
 0x140   :  { %v1572_v8 = vrot.slane %v1571_v2, 2  ;;  %v1640_v5 = vadd.f32 %v1639_v59, %v1638_v47  ;;  %v1645_v14 = vrot.slane %v1644_v0, 2 }
 0x141   :  { %v1477_v46 = vadd.f32 %v1476_v63, %v1464_v3 }
 0x142   :  { %v1573_v12 = vadd.f32 %v1572_v8, %v1571_v2  ;;  %v1627_v2 = vrot.slane %v1626_v60, 2  ;;  %v1641_v26 = vrot.slane %v1640_v5, 1 }
 0x144   :  { %v1574_v16 = vrot.slane %v1573_v12, 1  ;;  %v1628_v22 = vadd.f32 %v1627_v2, %v1626_v60 }
 0x146   :  { %v1465_v17 = vpop.f32.mrf.mxu2  ;;  %v1575_v25 = vadd.f32 %v1574_v16, %v1573_v12  ;;  %v1634_v12 = vadd.f32 %v1633_v62, %v1632_v51  ;;  %v1629_v39 = vrot.slane %v1628_v22, 1 }
 0x147   :  { %v1621_v17 = vrot.slane %v1620_v1, 2 }
 0x148   :  { %v3072_v31 = vmul.f32 %v3050_v9, %v1575_v25  ;;  %v1635_v34 = vrot.slane %v1634_v12, 1 }
 0x149   :  { %v1622_v37 = vadd.f32 %v1621_v17, %v1620_v1 }
 0x14a   :  { %v1608_v35 = vsub.f32 %v3046_v57, %v3072_v31  ;;  %v1636_v45 = vadd.f32 %v1635_v34, %v1634_v12 }
 0x14c   :  { %v1616_v41 = vmul.f32 %v1608_v35, %v1608_v35  ;;  %v1646_v35 = vadd.f32 %v1645_v14, %v1644_v0  ;;  %v1669_v58 = vmul.f32 %v1636_v45, %v3050_v9 }
 0x14e   :  { %v1649_v48 = vrot.slane %v1616_v41, 4 }
 0x150   :  { %v1650_v61 = vadd.f32 %v1649_v48, %v1616_v41  ;;  %v1528_v8 = vpop.f32.mrf.mxu3  ;;  %v1642_v41 = vadd.f32 %v1641_v26, %v1640_v5  ;;  %v1623_v48 = vrot.slane %v1622_v37, 1 }
 0x152   :  { %v1651_v6 = vrot.slane %v1650_v61, 2  ;;  %v1670_v53 = vmul.f32 %v1642_v41, %v3050_v9 }
 0x154   :  { %v1652_v32 = vadd.f32 %v1651_v6, %v1650_v61  ;;  %v1624_v61 = vadd.f32 %v1623_v48, %v1622_v37 }
 0x155   :  { %v1489_v49 = vpop.f32.mrf.mxu0 }
 0x156   :  { %v1490_v54 = vadd.f32 %v1489_v49, %v1477_v46  ;;  %v1502_v55 = vpop.f32.mrf.mxu1  ;;  %v1653_v42 = vrot.slane %v1652_v32, 1  ;;  %v1647_v46 = vrot.slane %v1646_v35, 1  ;;  %v1667_v6 = vmul.f32 %v1624_v61, %v3050_v9 }
 0x157   :  { %v1503_v52 = vadd.f32 %v1502_v55, %v240_v50  ;;  %v1630_v50 = vadd.f32 %v1629_v39, %v1628_v22 }
 0x158   :  { %v3084_v56 = vmax.f32 %v1490_v54, 0.0  ;;  %v1530_v44 = vpop.f32.mrf.mxu3  ;;  %v1654_v54 = vadd.f32 %v1653_v42, %v1652_v32  ;;  %v1648_v60 = vadd.f32 %v1647_v46, %v1646_v35  ;;  %v3120_v17 = vadd.f32 1e-05, %v1667_v6 }
 0x159   :  { %v1668_v62 = vmul.f32 %v1630_v50, %v3050_v9 }
 0x15a   :  { %v1576_v63 = vrot.slane %v3084_v56, 4  ;;  %v1672_v1 = vmul.f32 %v1654_v54, %v3050_v9  ;;  %vm1690_vm15 = vweird.f32 %v3120_v17 }
 0x15c   :  { %v1577_v4 = vadd.f32 %v1576_v63, %v3084_v56  ;;  %v3100_v63 = vadd.f32 1e-05, %v1670_v53  ;;  %v3113_v12 = vadd.f32 1e-05, %v1672_v1 }
 0x15d   :  { %v1491_v10 = vpop.f32.mrf.mxu0 }
 0x15e   :  { %v1515_v24 = vpop.f32.mrf.mxu2  ;;  %v1578_v15 = vrot.slane %v1577_v4, 2  ;;  %v1504_v16 = vpop.f32.mrf.mxu1  ;;  %2870 = vrsqrt.f32 %v3100_v63  ;;  %vm1720_vm1 = vweird.f32 %v3100_v63  ;;  %vm1740_vm13 = vweird.f32 %v3113_v12 }
 0x15f   :  { %v1516_v7 = vadd.f32 %v1515_v24, %v1503_v52  ;;  %v1671_v24 = vmul.f32 %v1648_v60, %v3050_v9 }
 0x160   :  { %v1579_v25 = vadd.f32 %v1578_v15, %v1577_v4  ;;  %v3103_v4 = vadd.f32 1e-05, %v1669_v58 }
 0x161   :  { %v1529_v21 = vadd.f32 %v1528_v8, %v1516_v7  ;;  %v3110_v8 = vadd.f32 1e-05, %v1668_v62  ;;  %v3118_v15 = vadd.f32 1e-05, %v1671_v24 }
 0x162   :  { %v1580_v36 = vrot.slane %v1579_v25, 1  ;;  %2872 = vrsqrt.f32 %v3103_v4  ;;  %vm1710_vm6 = vweird.f32 %v3103_v4 }
 0x163   :  { %v3088_v33 = vmax.f32 %v1529_v21, 0.0  ;;  %2874 = vrsqrt.f32 %v3110_v8  ;;  %vm1700_vm4 = vweird.f32 %v3110_v8  ;;  %vm1730_vm10 = vweird.f32 %v3118_v15 }
 0x164   :  { %v1581_v3 = vadd.f32 %v1580_v36, %v1579_v25  ;;  %2876 = vrsqrt.f32 %v3113_v12  ;;  %v3125_v32 = vpop.eup %2870 }
 0x165   :  { %v1582_v38 = vrot.slane %v3088_v33, 4  ;;  %2878 = vrsqrt.f32 %v3118_v15  ;;  %v1715_v39 = vmul.f32 %v3125_v32, %v3100_v63  ;;  %vm1721_vm2 = vweird.f32 %v3125_v32 }
 0x166   :  { %v1517_v40 = vpop.f32.mrf.mxu2  ;;  %v3093_v47 = vmul.f32 %v3050_v9, %v1581_v3  ;;  %2880 = vrsqrt.f32 %v3120_v17  ;;  %vm3175_vm7 = vmor %vm1720_vm1, %vm1721_vm2 }
 0x167   :  { %v1583_v43 = vadd.f32 %v1582_v38, %v3088_v33  ;;  %v1716_v48 = vmul.f32 %v3125_v32, %v1715_v39 }
 0x168   :  { %v1609_v51 = vsub.f32 %v3084_v56, %v3093_v47  ;;  %v3128_v35 = vpop.eup %2872 }
 0x169   :  { %v1584_v49 = vrot.slane %v1583_v43, 2  ;;  %v3131_v38 = vpop.eup %2874  ;;  %v1705_v41 = vmul.f32 %v3128_v35, %v3103_v4  ;;  %vm1711_vm3 = vweird.f32 %v3128_v35 }
 0x16a   :  { %v1617_v59 = vmul.f32 %v1609_v51, %v1609_v51  ;;  %v3137_v40 = vpop.eup %2876  ;;  %v1695_v45 = vmul.f32 %v3131_v38, %v3110_v8  ;;  %vm1701_vm5 = vweird.f32 %v3131_v38  ;;  %vm3179_vm8 = vmor %vm1710_vm6, %vm1711_vm3  ;;  %vm1781_vm6 = vcmask 1042434  }
 0x16b   :  { %v1585_v55 = vadd.f32 %v1584_v49, %v1583_v43  ;;  %v3141_v43 = vpop.eup %2878  ;;  %v1735_v49 = vmul.f32 %v3137_v40, %v3113_v12  ;;  %v1706_v50 = vmul.f32 %v3128_v35, %v1705_v41  ;;  %vm1741_vm9 = vweird.f32 %v3137_v40  ;;  %vm3194_vm12 = vmor %vm1700_vm4, %vm1701_vm5 }
 0x16c   :  { %v1655_v0 = vrot.slane %v1617_v59, 4  ;;  %v3144_v44 = vpop.eup %2880  ;;  %v1725_v51 = vmul.f32 %v3141_v43, %v3118_v15  ;;  %vm1731_vm11 = vweird.f32 %v3141_v43  ;;  %vm3205_vm0 = vmor %vm1740_vm13, %vm1741_vm9  ;;  %vm1779_vm9 = vcmask 1040384  }
 0x16d   :  { %v1586_v52 = vrot.slane %v1585_v55, 1  ;;  %v1685_v54 = vmul.f32 %v3144_v44, %v3120_v17  ;;  %v1736_v61 = vmul.f32 %v3137_v40, %v1735_v49  ;;  %vm3209_vm1 = vmor %vm1730_vm10, %vm1731_vm11  ;;  %vm1691_vm4 = vweird.f32 %v3144_v44 }
 0x16e   :  { %v1656_v5 = vadd.f32 %v1655_v0, %v1617_v59  ;;  %v1717_v59 = vmul.f32 0.5, %v1716_v48  ;;  %v1726_v62 = vmul.f32 %v3141_v43, %v1725_v51  ;;  %vm1783_vm10 = vcmask 1041408   ;;  %vm1692_vm13 = vmor %vm1690_vm15, %vm1691_vm4 }
 0x16f   :  { %v1587_v2 = vadd.f32 %v1586_v52, %v1585_v55  ;;  %v1696_v55 = vmul.f32 %v3131_v38, %v1695_v45  ;;  %v1707_v52 = vmul.f32 0.5, %v1706_v50  ;;  %vm1785_vm11 = vcmask 1044484  }
 0x170   :  { %v1657_v10 = vrot.slane %v1656_v5, 2  ;;  %v1718_v6 = vsub.f32 1.5, %v1717_v59 }
 0x171   :  { %v3108_v7 = vmul.f32 %v3050_v9, %v1587_v2  ;;  %v1686_v2 = vmul.f32 %v3144_v44, %v1685_v54  ;;  %v1697_v24 = vmul.f32 0.5, %v1696_v55 }
 0x172   :  { %v1658_v16 = vadd.f32 %v1657_v10, %v1656_v5  ;;  %v1708_v10 = vsub.f32 1.5, %v1707_v52 }
 0x173   :  { %v1610_v14 = vsub.f32 %v3088_v33, %v3108_v7 }
 0x174   :  { %v1659_v22 = vrot.slane %v1658_v16, 1 }
 0x175   :  { %v1618_v21 = vmul.f32 %v1610_v14, %v1610_v14  ;;  %v1727_v14 = vmul.f32 0.5, %v1726_v62 }
 0x176   :  { %v1660_v26 = vadd.f32 %v1659_v22, %v1658_v16  ;;  %v1687_v16 = vmul.f32 0.5, %v1686_v2  ;;  %v1698_v22 = vsub.f32 1.5, %v1697_v24 }
 0x177   :  { %v1661_v25 = vrot.slane %v1618_v21, 4 }
 0x178   :  { %v1673_v36 = vmul.f32 %v1660_v26, %v3050_v9  ;;  %v1688_v39 = vsub.f32 1.5, %v1687_v16  ;;  %v1699_v45 = vmul.f32 %v3131_v38, %v1698_v22 }
 0x179   :  { %v1662_v34 = vadd.f32 %v1661_v25, %v1618_v21  ;;  %v1719_v25 = vmul.f32 %v3125_v32, %v1718_v6  ;;  %v1675_v6 = vld [vmem:[%s3276_s3] sm:$0xff] }
 0x17a   :  { %v3135_v3 = vadd.f32 1e-05, %v1673_v36  ;;  %v1709_v36 = vmul.f32 %v3128_v35, %v1708_v10  ;;  %v1689_v59 = vmul.f32 %v3144_v44, %v1688_v39 }
 0x17b   :  { %v1663_v37 = vrot.slane %v1662_v34, 2  ;;  %v1723_v48 = vsel %vm3175_vm7, %v3125_v32, %v1719_v25 }
 0x17c   :  { %2882 = vrsqrt.f32 %v3135_v3  ;;  %v1713_v4 = vsel %vm3179_vm8, %v3128_v35, %v1709_v36  ;;  %v1703_v35 = vsel %vm3194_vm12, %v3131_v38, %v1699_v45  ;;  %v1774_v15 = vrot.slane %v1723_v48, 5 }
 0x17d   :  { %v1664_v42 = vadd.f32 %v1663_v37, %v1662_v34  ;;  %v1728_v37 = vsub.f32 1.5, %v1727_v14  ;;  %vm1750_vm2 = vweird.f32 %v3135_v3  ;;  %v1773_v38 = vrot.slane %v1713_v4, 6 }
 0x17e   :  { %v1772_v62 = vrot.slane %v1703_v35, 7  ;;  %vm1787_vm12 = vcmask 1046534  }
 0x17f   :  { %v1665_v46 = vrot.slane %v1664_v42, 1  ;;  %v1729_v50 = vmul.f32 %v3141_v43, %v1728_v37  ;;  %v1782_v24 = vsel %vm1781_vm6, %v1773_v38, %v1774_v15 }
 0x181   :  { %v1666_v53 = vadd.f32 %v1665_v46, %v1664_v42  ;;  %v1733_v52 = vsel %vm3209_vm1, %v3141_v43, %v1729_v50 }
 0x182   :  { %v3158_v60 = vpop.eup %2882  ;;  %v1775_v43 = vrot.slane %v1733_v52, 4 }
 0x183   :  { %v1674_v58 = vmul.f32 %v1666_v53, %v3050_v9  ;;  %v1745_v0 = vmul.f32 %v3158_v60, %v3135_v3  ;;  %v1737_v9 = vmul.f32 0.5, %v1736_v61  ;;  %vm1751_vm14 = vweird.f32 %v3158_v60 }
 0x184   :  { %vm3219_vm5 = vmor %vm1750_vm2, %vm1751_vm14  ;;  %vm1789_vm14 = vcmask 1045508  }
 0x185   :  { %v1683_v1 = vadd.f32 1e-05, %v1674_v58  ;;  %v1746_v5 = vmul.f32 %v3158_v60, %v1745_v0  ;;  %v1738_v26 = vsub.f32 1.5, %v1737_v9 }
 0x187   :  { %2884 = vrsqrt.f32 %v1683_v1  ;;  %v1747_v21 = vmul.f32 0.5, %v1746_v5  ;;  %v1739_v49 = vmul.f32 %v3137_v40, %v1738_v26  ;;  %vm1760_vm7 = vweird.f32 %v1683_v1 }
 0x189   :  { %v1748_v41 = vsub.f32 1.5, %v1747_v21  ;;  %v1743_v12 = vsel %vm3205_vm0, %v3137_v40, %v1739_v49  ;;  %vm1791_vm0 = vcmask 1043456  }
 0x18a   :  { %v1776_v0 = vrot.slane %v1743_v12, 3 }
 0x18b   :  { %v1749_v32 = vmul.f32 %v3158_v60, %v1748_v41 }
 0x18c   :  { %v1786_v10 = vsel %vm1785_vm11, %v1775_v43, %v1776_v0 }
 0x18d   :  { %v2885_v34 = vpop.eup %2884  ;;  %v1753_v3 = vsel %vm3219_vm5, %v3158_v60, %v1749_v32 }
 0x18e   :  { %v1755_v42 = vmul.f32 %v2885_v34, %v1683_v1  ;;  %vm1761_vm3 = vweird.f32 %v2885_v34  ;;  %v1777_v5 = vrot.slane %v1753_v3, 2  ;;  %v1693_v1 = vsel %vm1692_vm13, %v3144_v44, %v1689_v59 }
 0x18f   :  { %vm1762_vm8 = vmor %vm1760_vm7, %vm1761_vm3  ;;  %v1780_v9 = vsel %vm1779_vm9, %v1693_v1, %v1772_v62 }
 0x190   :  { %v1756_v8 = vmul.f32 %v2885_v34, %v1755_v42  ;;  %v1784_v17 = vsel %vm1783_vm10, %v1780_v9, %v1782_v24 }
 0x192   :  { %v1757_v53 = vmul.f32 0.5, %v1756_v8 }
 0x194   :  { %v1758_v58 = vsub.f32 1.5, %v1757_v53 }
 0x196   :  { %v1759_v40 = vmul.f32 %v2885_v34, %v1758_v58 }
 0x198   :  { %v1763_v2 = vsel %vm1762_vm8, %v2885_v34, %v1759_v40 }
 0x199   :  { %v1778_v60 = vrot.slane %v1763_v2, 1 }
 0x19b   :  { %v1788_v14 = vsel %vm1787_vm12, %v1777_v5, %v1778_v60 }
 0x19c   :  { %v1790_v16 = vsel %vm1789_vm14, %v1786_v10, %v1788_v14 }
 0x19d   :  { %v1792_v21 = vsel %vm1791_vm0, %v1784_v17, %v1790_v16 }
 0x19e   :  { %v1794_v22 = vmul.f32 %v1792_v21, %v1675_v6 }
 0x1a0   :  { %v1797_v25 = vperm.slane %v1794_v22, 0  ;;  %v1798_v44 = vperm.slane %v1794_v22, 1  ;;  %v1799_v26 = vperm.slane %v1794_v22, 2  ;;  %v1800_v34 = vperm.slane %v1794_v22, 3 }
 0x1a1   :  { %v1801_v36 = vperm.slane %v1794_v22, 4  ;;  %v1802_v37 = vperm.slane %v1794_v22, 5  ;;  %v1803_v39 = vperm.slane %v1794_v22, 6  ;;  %v1804_v41 = vperm.slane %v1794_v22, 7 }
 0x1a2   :  { %v1814_v42 = vmul.f32 %v1798_v44, %v3059_v20  ;;  %v1815_v45 = vmul.f32 %v1799_v26, %v3056_v13  ;;  %v1816_v63 = vmul.f32 %v1800_v34, %v3053_v11  ;;  %v1813_v4 = vmul.f32 %v1797_v25, %v3069_v30 }
 0x1a3   :  { %v1817_v46 = vmul.f32 %v1801_v36, %v3066_v29  ;;  %v1818_v48 = vmul.f32 %v1802_v37, %v3072_v31  ;;  %v1819_v49 = vmul.f32 %v1803_v39, %v3093_v47  ;;  %v1820_v8 = vmul.f32 %v1804_v41, %v3108_v7  ;;  %v1795_v29 = vld [vmem:[%s3277_s4] sm:$0xff]  ;;  %s2942_s4 = smov [#allocation5]  }
 0x1a4   :  { %v1829_v50 = vrot.slane %v1814_v42, 7  ;;  %v1830_v51 = vrot.slane %v1815_v45, 6  ;;  %v1831_v32 = vrot.slane %v1816_v63, 5  ;;  %v1851_v12 = vmul.f32 %v1803_v39, %v3084_v56  ;;  %s1891_s6 = sshll.u32 %s2942_s4, 4  ;;  %s1892_s6 = int_to_ptr.vmem [resolvable:$true] %s1891_s6 }
 0x1a5   :  { %v1832_v53 = vrot.slane %v1817_v46, 4  ;;  %v1833_v35 = vrot.slane %v1818_v48, 3  ;;  %v1834_v20 = vrot.slane %v1819_v49, 2  ;;  %v1835_v15 = vrot.slane %v1820_v8, 1 }
 0x1a6   :  { %v1836_v13 = vsel %vm1779_vm9, %v1813_v4, %v1829_v50  ;;  %v1837_v11 = vsel %vm1781_vm6, %v1830_v51, %v1831_v32  ;;  %v1852_v58 = vmul.f32 %v1804_v41, %v3088_v33  ;;  %v1845_v59 = vmul.f32 %v1797_v25, %v3035_v28 }
 0x1a7   :  { %v1838_v31 = vsel %vm1783_vm10, %v1836_v13, %v1837_v11  ;;  %v1839_v47 = vsel %vm1785_vm11, %v1832_v53, %v1833_v35  ;;  %v1840_v30 = vsel %vm1787_vm12, %v1834_v20, %v1835_v15  ;;  %v1846_v40 = vmul.f32 %v1798_v44, %v3028_v23 }
 0x1a8   :  { %v1841_v7 = vsel %vm1789_vm14, %v1839_v47, %v1840_v30  ;;  %v1847_v62 = vmul.f32 %v1799_v26, %v3026_v19  ;;  %v1848_v56 = vmul.f32 %v1800_v34, %v3024_v18  ;;  %v1849_v28 = vmul.f32 %v1801_v36, %v3032_v27 }
 0x1a9   :  { %v1842_v54 = vsel %vm1791_vm0, %v1838_v31, %v1841_v7  ;;  %v1850_v9 = vmul.f32 %v1802_v37, %v3046_v57 }
 0x1aa   :  { %v1844_v55 = vsub.f32 %v1795_v29, %v1842_v54 }
 0x1ac   :  { %v1860_v38 = vperm.slane %v1844_v55, 6  ;;  %v1861_v61 = vperm.slane %v1844_v55, 7  ;;  %v1854_v52 = vperm.slane %v1844_v55, 0  ;;  %v1855_v3 = vperm.slane %v1844_v55, 1 }
 0x1ad   :  { %v1856_v0 = vperm.slane %v1844_v55, 2  ;;  %v1857_v2 = vperm.slane %v1844_v55, 3  ;;  %v1858_v5 = vperm.slane %v1844_v55, 4  ;;  %v1859_v1 = vperm.slane %v1844_v55, 5 }
 0x1ae   :  { %v1876_v24 = vadd.f32 %v1860_v38, %v1851_v12  ;;  %v1877_v43 = vadd.f32 %v1861_v61, %v1852_v58  ;;  %v1870_v60 = vadd.f32 %v1854_v52, %v1845_v59  ;;  %v1871_v33 = vadd.f32 %v1855_v3, %v1846_v40 }
 0x1af   :  { %v1872_v6 = vadd.f32 %v1856_v0, %v1847_v62  ;;  %v1873_v23 = vadd.f32 %v1857_v2, %v1848_v56  ;;  %v1874_v10 = vadd.f32 %v1858_v5, %v1849_v28  ;;  %v1875_v19 = vadd.f32 %v1859_v1, %v1850_v9 }
 0x1b0   :  { %1885 = vst [vmem:[#allocation5 + $0x38] sm:$0xff] %v1877_v43 }
 0x1b1   :  { %1884 = vst [vmem:[#allocation5 + $0x30] sm:$0xff] %v1876_v24 }
 0x1b2   :  { %1878 = vst [vmem:[#allocation5] sm:$0xff] %v1870_v60 }
 0x1b3   :  { %1879 = vst [vmem:[#allocation5 + $0x8] sm:$0xff] %v1871_v33 }
 0x1b4   :  { %1880 = vst [vmem:[#allocation5 + $0x10] sm:$0xff] %v1872_v6 }
 0x1b5   :  { %1881 = vst [vmem:[#allocation5 + $0x18] sm:$0xff] %v1873_v23 }
 0x1b6   :  { %1882 = vst [vmem:[#allocation5 + $0x20] sm:$0xff] %v1874_v10 }
 0x1b7   :  { %1883 = vst [vmem:[#allocation5 + $0x28] sm:$0xff] %v1875_v19 }
 0x1b8   :  { %1896 = dma.vmem_to_hbm [thread:$0]  %s1892_s6, 1024, %s1894_s9, [#allocation4]  }
 0x1b9   :  { %2936 = dma.done.wait [#allocation4], 1024  }
 0x1ba   :  { %2937 = vsyncadd [#allocation4], 4294966272 }
 0x1bb   :  { %1901 = vsyncpa [#allocation3], 1 }
 0x1bc   :  { %1902 = vsyncpa [#allocation4], 1 }

</bundles_post_ra>
